<compile_context>
chip_gen: v5e
topology: v5e:2x2
jax: 0.10.0
libtpu: 0.0.40
codegen_flags: <defaults>
</compile_context>

<pallas_src>
import functools

import jax
import jax.numpy as jnp
from jax.experimental import pallas as pl
from jax.experimental.pallas import tpu as pltpu


# MXU operand dtype.  Elementwise / accumulation stays float32, so bf16 is safe
# on all of v5e / v6e / v7x (only the bf16 VPU/EUP path is missing on v5e, and
# this kernel never uses it).
MATMUL_DTYPE = jnp.bfloat16

LN_EPS = 1e-5
VMEM_LIMIT_BYTES = 32 * 1024 * 1024
LIQUID_COL_BLOCK = 16384  # lane-chunk of the D*D axis in the liquid-weight kernel


# ----------------------------- in-kernel helpers -----------------------------

def _dot(a, b):
    return jnp.dot(a.astype(MATMUL_DTYPE), b.astype(MATMUL_DTYPE),
                   preferred_element_type=jnp.float32)


def _gelu(x):
    # TODO(synk): exact-erf GELU (nn.GELU default) approximated with tanh form.
    c = jnp.asarray(0.7978845608028654, x.dtype)  # sqrt(2/pi)
    return 0.5 * x * (1.0 + jnp.tanh(c * (x + 0.044715 * x * x * x)))


def _softmax(z):
    m = jnp.max(z, axis=-1, keepdims=True)
    e = jnp.exp(z - m)
    return e * pl.reciprocal(jnp.sum(e, axis=-1, keepdims=True), approx=True)


def _layernorm(x, gamma, beta):
    inv_d = 1.0 / x.shape[-1]
    mu = jnp.sum(x, axis=-1, keepdims=True) * inv_d
    xc = x - mu
    var = jnp.sum(xc * xc, axis=-1, keepdims=True) * inv_d
    return xc * jax.lax.rsqrt(var + LN_EPS) * gamma + beta


# --------------------------------- kernels -----------------------------------

def liquid_weight_kernel(adapt_ref, wa_ref, wb_ref, o_ref):
    # Per (layer, lane-chunk) block of the effective (transposed) LiquidLinear
    # weights:
    #   o[l, 0, i*D + j] = W_base[l][j, i] + adapt_bias[l][j*D + i]
    #                      + sum_a adapt[a] * W_adapt[l][j*D + i, a]
    # i.e. o reshaped to (L, D_in, D_out) is W_eff^T per layer (x @ W form).
    o_ref[0] = (_dot(adapt_ref[...], wa_ref[0]) + wb_ref[0]).astype(o_ref.dtype)


def semantic_fwd_kernel(x_ref, weff_ref, wqkv_ref, wo_ref, w1_ref, w2_ref,
                        bqkv_ref, b1_ref, bias_ref, o_ref, *,
                        seq_len, num_heads):
    layer = pl.program_id(1)
    M, D = x_ref.shape                 # M = batch_block * seq_len
    S = seq_len
    BB = M // S
    H = num_heads
    dh = D // H
    scale = 1.0 / float(dh) ** 0.5

    # Initialize the carried activation from the input at the first layer.  The
    # output block index is constant along the (arbitrary) layer axis, so it
    # stays resident in VMEM and acts as the layer-to-layer carry.
    @pl.when(layer == 0)
    def _init():
        o_ref[...] = x_ref[...]

    bl = bias_ref[0]                   # (8, D) packed per-layer bias/LN rows
    x = o_ref[...]                     # (M, D) float32 carried activation

    # --- LiquidLinear: x @ (W_base + adapt_delta)^T + b_base
    x = _dot(x, weff_ref[0]) + bl[0:1, :]

    # --- MultiheadAttention (self-attention, eval mode -> no dropout)
    qkv = _dot(x, wqkv_ref[0]) + bqkv_ref[0]          # (M, 3D) fused q/k/v
    ctx_rows = []
    for b in range(BB):                               # independent sequences
        rows = slice(b * S, (b + 1) * S)
        q = qkv[rows, 0:D] * scale                    # (S, D)
        kT = qkv[rows, D:2 * D].T                     # (D, S): ONE transpose/seq
        v = qkv[rows, 2 * D:3 * D]                    # (S, D)
        heads = []
        for h in range(H):
            cols = slice(h * dh, (h + 1) * dh)
            p = _softmax(_dot(q[:, cols], kT[cols, :]))   # (S, S)
            heads.append(_dot(p, v[:, cols]))             # (S, dh)
        ctx_rows.append(jnp.concatenate(heads, axis=-1))  # (S, D)
    ctx = jnp.concatenate(ctx_rows, axis=0) if BB > 1 else ctx_rows[0]
    # single merged output projection (one MXU push instead of H with K=dh)
    attn = _dot(ctx, wo_ref[0]) + bl[1:2, :]

    # --- residual + LayerNorm1
    x = _layernorm(x + attn, bl[3:4, :], bl[4:5, :])

    # --- FFN: Linear(D, 4D) -> GELU -> Linear(4D, D)
    h1 = _gelu(_dot(x, w1_ref[0]) + b1_ref[0])        # (M, 4D) lane-dense
    ffn = _dot(h1, w2_ref[0]) + bl[2:3, :]

    # --- residual + LayerNorm2
    x = _layernorm(x + ffn, bl[5:6, :], bl[6:7, :])

    o_ref[...] = x


# ----------------------------- parameter setup --------------------------------

def make_ref_params(key, *, D, A, L):
    """Random parameters in the reference (PyTorch) tensor layout."""
    kit = iter(jax.random.split(key, 8 * L))

    def xav(shape):  # nn.Linear weight is (out_features, in_features)
        fo, fi = shape
        lim = (6.0 / (fi + fo)) ** 0.5
        return jax.random.uniform(next(kit), shape, jnp.float32, -lim, lim)

    zeros = lambda s: jnp.zeros(s, jnp.float32)
    ones = lambda s: jnp.ones(s, jnp.float32)

    layers = []
    for _ in range(L):
        layers.append(dict(
            ll_wb=xav((D, D)), ll_bb=zeros((D,)),             # base_linear
            ll_wa=xav((D * D, A)), ll_ba=zeros((D * D,)),     # adapt_linear
            attn_in_w=xav((3 * D, D)), attn_in_b=zeros((3 * D,)),
            attn_out_w=xav((D, D)), attn_out_b=zeros((D,)),
            ffn_w1=xav((4 * D, D)), ffn_b1=zeros((4 * D,)),
            ffn_w2=xav((D, 4 * D)), ffn_b2=zeros((D,)),
            ln1_g=ones((D,)), ln1_b=zeros((D,)),
            ln2_g=ones((D,)), ln2_b=zeros((D,)),
        ))
    return layers


def pack_params(layers, *, D):
    """Pack reference parameters into the kernel layout (transposed, stacked,
    matmul weights stored in MATMUL_DTYPE)."""
    # new flat index i*D + j  <-  reference flat index j*D + i   (W -> W^T)
    perm = jnp.arange(D * D).reshape(D, D).T.reshape(-1)

    wd = MATMUL_DTYPE
    return dict(
        # (L, A, D*D), bf16: adapt-projection weights for the liquid kernel
        wa_all=jnp.stack([p['ll_wa'][perm, :].T for p in layers]).astype(wd),
        # (L, 1, D*D), f32: base weight (transposed, flattened) + adapt bias
        wb_all=jnp.stack([(p['ll_ba'][perm] + p['ll_wb'].T.reshape(-1))[None, :]
                          for p in layers]),
        wqkv_T=jnp.stack([p['attn_in_w'].T for p in layers]).astype(wd),   # (L, D, 3D)
        bqkv=jnp.stack([p['attn_in_b'][None, :] for p in layers]),         # (L, 1, 3D)
        wo_T=jnp.stack([p['attn_out_w'].T for p in layers]).astype(wd),    # (L, D, D)
        w1_T=jnp.stack([p['ffn_w1'].T for p in layers]).astype(wd),        # (L, D, 4D)
        b1=jnp.stack([p['ffn_b1'][None, :] for p in layers]),              # (L, 1, 4D)
        w2_T=jnp.stack([p['ffn_w2'].T for p in layers]).astype(wd),        # (L, 4D, D)
        bias_d=jnp.stack([jnp.stack([p['ll_bb'], p['attn_out_b'], p['ffn_b2'],
                                     p['ln1_g'], p['ln1_b'],
                                     p['ln2_g'], p['ln2_b'],
                                     jnp.zeros((D,), jnp.float32)])
                          for p in layers]),                               # (L, 8, D)
    )


# --------------------------------- wrapper -------------------------------------

def semantic_forward(x, adapt_input, packed, *, num_heads, batch_block=None):
    B, S, D = x.shape
    L = packed['wqkv_T'].shape[0]
    A = adapt_input.shape[-1]
    assert D % num_heads == 0

    BB = batch_block if batch_block is not None else B
    assert B % BB == 0, "batch must be divisible by batch_block"
    assert (BB * S) % 8 == 0, "batch_block*seq must be a multiple of 8"
    NB = B // BB

    # (1) effective LiquidLinear weights for all layers, tiled over (layer,
    #     lane-chunk of D*D) so wa_all never has to be fully VMEM-resident.
    DD = D * D
    col_block = DD if DD <= LIQUID_COL_BLOCK else LIQUID_COL_BLOCK
    assert DD % col_block == 0
    n_col = DD // col_block

    weff_flat = pl.pallas_call(
        liquid_weight_kernel,
        out_shape=jax.ShapeDtypeStruct((L, 1, DD), MATMUL_DTYPE),
        grid=(L, n_col),
        in_specs=[
            pl.BlockSpec((1, A), lambda l, c: (0, 0)),
            pl.BlockSpec((1, A, col_block), lambda l, c: (l, 0, c)),
            pl.BlockSpec((1, 1, col_block), lambda l, c: (l, 0, c)),
        ],
        out_specs=pl.BlockSpec((1, 1, col_block), lambda l, c: (l, 0, c)),
        compiler_params=pltpu.CompilerParams(
            dimension_semantics=("parallel", "parallel"),
            vmem_limit_bytes=VMEM_LIMIT_BYTES),
    )(adapt_input, packed['wa_all'], packed['wb_all'])
    weff = weff_flat.reshape(L, D, D)                  # W_eff^T per layer, bf16

    # (2) the full L-layer SemanticModule stack: grid=(batch_blocks, layers).
    #     Layer weights stream through VMEM (double-buffered per layer); the
    #     activation is carried in the resident output block across layers.
    x2 = x.reshape(B * S, D)
    out = pl.pallas_call(
        functools.partial(semantic_fwd_kernel, seq_len=S, num_heads=num_heads),
        out_shape=jax.ShapeDtypeStruct((B * S, D), jnp.float32),
        grid=(NB, L),
        in_specs=[
            pl.BlockSpec((BB * S, D), lambda b, l: (b, 0)),        # x (read at l==0)
            pl.BlockSpec((1, D, D), lambda b, l: (l, 0, 0)),       # weff
            pl.BlockSpec((1, D, 3 * D), lambda b, l: (l, 0, 0)),   # wqkv
            pl.BlockSpec((1, D, D), lambda b, l: (l, 0, 0)),       # wo
            pl.BlockSpec((1, D, 4 * D), lambda b, l: (l, 0, 0)),   # w1
            pl.BlockSpec((1, 4 * D, D), lambda b, l: (l, 0, 0)),   # w2
            pl.BlockSpec((1, 1, 3 * D), lambda b, l: (l, 0, 0)),   # bqkv
            pl.BlockSpec((1, 1, 4 * D), lambda b, l: (l, 0, 0)),   # b1
            pl.BlockSpec((1, 8, D), lambda b, l: (l, 0, 0)),       # packed biases/LN
        ],
        out_specs=pl.BlockSpec((BB * S, D), lambda b, l: (b, 0)),
        compiler_params=pltpu.CompilerParams(
            dimension_semantics=("parallel", "arbitrary"),
            vmem_limit_bytes=VMEM_LIMIT_BYTES),
    )(x2, weff, packed['wqkv_T'], packed['wo_T'], packed['w1_T'],
      packed['w2_T'], packed['bqkv'], packed['b1'], packed['bias_d'])
    return out.reshape(B, S, D)


# ---------------------------------- main ---------------------------------------

if __name__ == "__main__":
    B = 4       # batch of independent sequences
    S = 8       # sequence length
    D = 32      # input_dim == hidden_dim
    A = 16      # adapt_dim
    H = 4       # num_heads
    L = 2       # num_layers

    key = jax.random.PRNGKey(0)
    kp, kx, ka = jax.random.split(key, 3)
    ref_layers = make_ref_params(kp, D=D, A=A, L=L)
    packed = pack_params(ref_layers, D=D)

    x = jax.random.normal(kx, (B, S, D), jnp.float32)
    adapt_input = jax.random.normal(ka, (1, A), jnp.float32)

    fwd = jax.jit(functools.partial(semantic_forward, num_heads=H, batch_block=2))
    out = jax.block_until_ready(fwd(x, adapt_input, packed))

    assert out.shape == (B, S, D)
    assert bool(jnp.all(jnp.isfinite(out)))
    print("KERNEL_OK")
</pallas_src>

<mosaic_0001>
module attributes {stable_mosaic.version = 11 : i64} {
  func.func @liquid_weight_kernel(%arg0: i32, %arg1: i32, %arg2: memref<1x16xf32, #tpu.memory_space<vmem>>, %arg3: memref<1x16x1024xbf16, #tpu.memory_space<vmem>>, %arg4: memref<1x1x1024xf32, #tpu.memory_space<vmem>>, %arg5: memref<1x1x1024xbf16, #tpu.memory_space<vmem>>) attributes {dimension_semantics = [#tpu.dimension_semantics<parallel>, #tpu.dimension_semantics<parallel>], iteration_bounds = array<i64: 2, 1>, scalar_prefetch = 0 : i64, scratch_operands = 0 : i64, tpu.core_type = #tpu.core_type<tc>, window_params = [{pipeline_mode = #tpu.pipeline_mode<synchronous>, transform_indices = @transform_0, window_bounds = array<i64: 1, 16>}, {transform_indices = @transform_1, window_bounds = array<i64: 1, 16, 1024>}, {transform_indices = @transform_2, window_bounds = array<i64: 1, 1, 1024>}, {transform_indices = @transform_3, window_bounds = array<i64: 1, 1, 1024>}]} {
    %c0 = arith.constant 0 : index
    %c0_0 = arith.constant 0 : index
    %0 = vector.load %arg2[%c0, %c0_0] : memref<1x16xf32, #tpu.memory_space<vmem>>, vector<1x16xf32>
    %c0_1 = arith.constant 0 : index
    %c0_2 = arith.constant 0 : index
    %c0_3 = arith.constant 0 : index
    %1 = vector.load %arg3[%c0_1, %c0_2, %c0_3] : memref<1x16x1024xbf16, #tpu.memory_space<vmem>>, vector<1x16x1024xbf16>
    %2 = vector.shape_cast %1 : vector<1x16x1024xbf16> to vector<16x1024xbf16>
    %3 = arith.truncf %0 : vector<1x16xf32> to vector<1x16xbf16>
    %cst = arith.constant dense<0.000000e+00> : vector<1x1024xf32>
    %4 = tpu.matmul %3, %2, %cst {dimension_numbers = #tpu.dot_dimension_numbers<[1], [0], [0], [1], [0, 0, 1, 1], [], []>} : vector<1x16xbf16>, vector<16x1024xbf16>, vector<1x1024xf32> -> vector<1x1024xf32>
    %c0_4 = arith.constant 0 : index
    %c0_5 = arith.constant 0 : index
    %c0_6 = arith.constant 0 : index
    %5 = vector.load %arg4[%c0_4, %c0_5, %c0_6] : memref<1x1x1024xf32, #tpu.memory_space<vmem>>, vector<1x1x1024xf32>
    %6 = vector.shape_cast %5 : vector<1x1x1024xf32> to vector<1x1024xf32>
    %7 = arith.addf %4, %6 : vector<1x1024xf32>
    %8 = arith.truncf %7 : vector<1x1024xf32> to vector<1x1024xbf16>
    %c0_7 = arith.constant 0 : index
    %c0_8 = arith.constant 0 : index
    %c0_9 = arith.constant 0 : index
    %9 = vector.load %arg5[%c0_7, %c0_8, %c0_9] : memref<1x1x1024xbf16, #tpu.memory_space<vmem>>, vector<1x1x1024xbf16>
    %10 = vector.shape_cast %9 : vector<1x1x1024xbf16> to vector<1x1024xbf16>
    %11 = vector.shape_cast %8 : vector<1x1024xbf16> to vector<1x1x1024xbf16>
    tpu.vector_store %arg5[%c0_7, %c0_8, %c0_9], %11 {strides = array<i32>} : memref<1x1x1024xbf16, #tpu.memory_space<vmem>>, vector<1x1x1024xbf16>,
    return
  }
  func.func @transform_0(%arg0: i32, %arg1: i32) -> (i32, i32) {
    %c0_i32 = arith.constant 0 : i32
    %c0_i32_0 = arith.constant 0 : i32
    %c0_i32_1 = arith.constant 0 : i32
    return %c0_i32, %c0_i32_0 : i32, i32
  }
  func.func @transform_1(%arg0: i32, %arg1: i32) -> (i32, i32, i32) {
    %c0_i32 = arith.constant 0 : i32
    %c0_i32_0 = arith.constant 0 : i32
    return %arg0, %c0_i32, %arg1 : i32, i32, i32
  }
  func.func @transform_2(%arg0: i32, %arg1: i32) -> (i32, i32, i32) {
    %c0_i32 = arith.constant 0 : i32
    %c0_i32_0 = arith.constant 0 : i32
    return %arg0, %c0_i32, %arg1 : i32, i32, i32
  }
  func.func @transform_3(%arg0: i32, %arg1: i32) -> (i32, i32, i32) {
    %c0_i32 = arith.constant 0 : i32
    %c0_i32_0 = arith.constant 0 : i32
    return %arg0, %c0_i32, %arg1 : i32, i32, i32
  }
}

module attributes {stable_mosaic.version = 11 : i64} {
  func.func @semantic_fwd_kernel(%arg0: i32, %arg1: i32, %arg2: memref<16x32xf32, #tpu.memory_space<vmem>>, %arg3: memref<1x32x32xbf16, #tpu.memory_space<vmem>>, %arg4: memref<1x32x96xbf16, #tpu.memory_space<vmem>>, %arg5: memref<1x32x32xbf16, #tpu.memory_space<vmem>>, %arg6: memref<1x32x128xbf16, #tpu.memory_space<vmem>>, %arg7: memref<1x128x32xbf16, #tpu.memory_space<vmem>>, %arg8: memref<1x1x96xf32, #tpu.memory_space<vmem>>, %arg9: memref<1x1x128xf32, #tpu.memory_space<vmem>>, %arg10: memref<1x8x32xf32, #tpu.memory_space<vmem>>, %arg11: memref<16x32xf32, #tpu.memory_space<vmem>>) attributes {dimension_semantics = [#tpu.dimension_semantics<parallel>, #tpu.dimension_semantics<arbitrary>], iteration_bounds = array<i64: 2, 2>, scalar_prefetch = 0 : i64, scratch_operands = 0 : i64, tpu.core_type = #tpu.core_type<tc>, window_params = [{transform_indices = @transform_0, window_bounds = array<i64: 16, 32>}, {transform_indices = @transform_1, window_bounds = array<i64: 1, 32, 32>}, {transform_indices = @transform_2, window_bounds = array<i64: 1, 32, 96>}, {transform_indices = @transform_3, window_bounds = array<i64: 1, 32, 32>}, {transform_indices = @transform_4, window_bounds = array<i64: 1, 32, 128>}, {transform_indices = @transform_5, window_bounds = array<i64: 1, 128, 32>}, {transform_indices = @transform_6, window_bounds = array<i64: 1, 1, 96>}, {transform_indices = @transform_7, window_bounds = array<i64: 1, 1, 128>}, {transform_indices = @transform_8, window_bounds = array<i64: 1, 8, 32>}, {transform_indices = @transform_9, window_bounds = array<i64: 16, 32>}]} {
    %c0_i32 = arith.constant 0 : i32
    %0 = arith.cmpi eq, %arg1, %c0_i32 : i32
    %1 = arith.extui %0 : i1 to i32
    %c0_i32_0 = arith.constant 0 : i32
    %2 = arith.cmpi ne, %1, %c0_i32_0 : i32
    scf.if %2 {
      %c0_80 = arith.constant 0 : index
      %c0_81 = arith.constant 0 : index
      %270 = vector.load %arg2[%c0_80, %c0_81] : memref<16x32xf32, #tpu.memory_space<vmem>>, vector<16x32xf32>
      %c0_82 = arith.constant 0 : index
      %c0_83 = arith.constant 0 : index
      %271 = vector.load %arg11[%c0_82, %c0_83] : memref<16x32xf32, #tpu.memory_space<vmem>>, vector<16x32xf32>
      tpu.vector_store %arg11[%c0_82, %c0_83], %270 {strides = array<i32>} : memref<16x32xf32, #tpu.memory_space<vmem>>, vector<16x32xf32>,
    } else {
    }
    %c0 = arith.constant 0 : index
    %c0_1 = arith.constant 0 : index
    %c0_2 = arith.constant 0 : index
    %3 = vector.load %arg10[%c0, %c0_1, %c0_2] : memref<1x8x32xf32, #tpu.memory_space<vmem>>, vector<1x8x32xf32>
    %4 = vector.shape_cast %3 : vector<1x8x32xf32> to vector<8x32xf32>
    %c0_3 = arith.constant 0 : index
    %c0_4 = arith.constant 0 : index
    %5 = vector.load %arg11[%c0_3, %c0_4] : memref<16x32xf32, #tpu.memory_space<vmem>>, vector<16x32xf32>
    %c0_5 = arith.constant 0 : index
    %c0_6 = arith.constant 0 : index
    %c0_7 = arith.constant 0 : index
    %6 = vector.load %arg3[%c0_5, %c0_6, %c0_7] : memref<1x32x32xbf16, #tpu.memory_space<vmem>>, vector<1x32x32xbf16>
    %7 = vector.shape_cast %6 : vector<1x32x32xbf16> to vector<32x32xbf16>
    %8 = arith.truncf %5 : vector<16x32xf32> to vector<16x32xbf16>
    %cst = arith.constant dense<0.000000e+00> : vector<16x32xf32>
    %9 = tpu.matmul %8, %7, %cst {dimension_numbers = #tpu.dot_dimension_numbers<[1], [0], [0], [1], [0, 0, 1, 1], [], []>} : vector<16x32xbf16>, vector<32x32xbf16>, vector<16x32xf32> -> vector<16x32xf32>
    %10 = vector.extract_strided_slice %4 {offsets = [0, 0], sizes = [1, 32], strides = [1, 1]} : vector<8x32xf32> to vector<1x32xf32>
    %11 = vector.broadcast %10 : vector<1x32xf32> to vector<16x32xf32>
    %12 = arith.addf %9, %11 : vector<16x32xf32>
    %c0_8 = arith.constant 0 : index
    %c0_9 = arith.constant 0 : index
    %c0_10 = arith.constant 0 : index
    %13 = vector.load %arg4[%c0_8, %c0_9, %c0_10] : memref<1x32x96xbf16, #tpu.memory_space<vmem>>, vector<1x32x96xbf16>
    %14 = vector.shape_cast %13 : vector<1x32x96xbf16> to vector<32x96xbf16>
    %15 = arith.truncf %12 : vector<16x32xf32> to vector<16x32xbf16>
    %cst_11 = arith.constant dense<0.000000e+00> : vector<16x96xf32>
    %16 = tpu.matmul %15, %14, %cst_11 {dimension_numbers = #tpu.dot_dimension_numbers<[1], [0], [0], [1], [0, 0, 1, 1], [], []>} : vector<16x32xbf16>, vector<32x96xbf16>, vector<16x96xf32> -> vector<16x96xf32>
    %c0_12 = arith.constant 0 : index
    %c0_13 = arith.constant 0 : index
    %c0_14 = arith.constant 0 : index
    %17 = vector.load %arg8[%c0_12, %c0_13, %c0_14] : memref<1x1x96xf32, #tpu.memory_space<vmem>>, vector<1x1x96xf32>
    %18 = vector.shape_cast %17 : vector<1x1x96xf32> to vector<1x96xf32>
    %19 = vector.broadcast %18 : vector<1x96xf32> to vector<16x96xf32>
    %20 = arith.addf %16, %19 : vector<16x96xf32>
    %21 = vector.extract_strided_slice %20 {offsets = [0, 0], sizes = [8, 32], strides = [1, 1]} : vector<16x96xf32> to vector<8x32xf32>
    %cst_15 = arith.constant 0.353553385 : f32
    %22 = vector.broadcast %cst_15 : f32 to vector<8x32xf32>
    %23 = arith.mulf %21, %22 : vector<8x32xf32>
    %24 = vector.extract_strided_slice %20 {offsets = [0, 32], sizes = [8, 32], strides = [1, 1]} : vector<16x96xf32> to vector<8x32xf32>
    %25 = tpu.transpose %24, [1, 0] : vector<8x32xf32> -> vector<32x8xf32>
    %26 = vector.extract_strided_slice %20 {offsets = [0, 64], sizes = [8, 32], strides = [1, 1]} : vector<16x96xf32> to vector<8x32xf32>
    %27 = vector.extract_strided_slice %23 {offsets = [0, 0], sizes = [8, 8], strides = [1, 1]} : vector<8x32xf32> to vector<8x8xf32>
    %28 = vector.extract_strided_slice %25 {offsets = [0, 0], sizes = [8, 8], strides = [1, 1]} : vector<32x8xf32> to vector<8x8xf32>
    %29 = arith.truncf %27 : vector<8x8xf32> to vector<8x8xbf16>
    %30 = arith.truncf %28 : vector<8x8xf32> to vector<8x8xbf16>
    %cst_16 = arith.constant dense<0.000000e+00> : vector<8x8xf32>
    %31 = tpu.matmul %29, %30, %cst_16 {dimension_numbers = #tpu.dot_dimension_numbers<[1], [0], [0], [1], [0, 0, 1, 1], [], []>} : vector<8x8xbf16>, vector<8x8xbf16>, vector<8x8xf32> -> vector<8x8xf32>
    %cst_17 = arith.constant dense<0xFF800000> : vector<8xf32>
    %32 = vector.multi_reduction <maximumf>, %31, %cst_17 [1] : vector<8x8xf32> to vector<8xf32>
    %33 = vector.shape_cast %32 : vector<8xf32> to vector<8x1xf32>
    %34 = vector.broadcast %33 : vector<8x1xf32> to vector<8x8xf32>
    %35 = arith.subf %31, %34 : vector<8x8xf32>
    %36 = math.exp %35 : vector<8x8xf32>
    %cst_18 = arith.constant dense<0.000000e+00> : vector<8xf32>
    %37 = vector.multi_reduction <add>, %36, %cst_18 [1] : vector<8x8xf32> to vector<8xf32>
    %38 = vector.shape_cast %37 : vector<8xf32> to vector<8x1xf32>
    %39 = tpu.reciprocal %38 {approx = true} : vector<8x1xf32> -> vector<8x1xf32>
    %40 = vector.broadcast %39 : vector<8x1xf32> to vector<8x8xf32>
    %41 = arith.mulf %36, %40 : vector<8x8xf32>
    %42 = vector.extract_strided_slice %26 {offsets = [0, 0], sizes = [8, 8], strides = [1, 1]} : vector<8x32xf32> to vector<8x8xf32>
    %43 = arith.truncf %41 : vector<8x8xf32> to vector<8x8xbf16>
    %44 = arith.truncf %42 : vector<8x8xf32> to vector<8x8xbf16>
    %cst_19 = arith.constant dense<0.000000e+00> : vector<8x8xf32>
    %45 = tpu.matmul %43, %44, %cst_19 {dimension_numbers = #tpu.dot_dimension_numbers<[1], [0], [0], [1], [0, 0, 1, 1], [], []>} : vector<8x8xbf16>, vector<8x8xbf16>, vector<8x8xf32> -> vector<8x8xf32>
    %46 = vector.extract_strided_slice %23 {offsets = [0, 8], sizes = [8, 8], strides = [1, 1]} : vector<8x32xf32> to vector<8x8xf32>
    %47 = vector.extract_strided_slice %25 {offsets = [8, 0], sizes = [8, 8], strides = [1, 1]} : vector<32x8xf32> to vector<8x8xf32>
    %48 = arith.truncf %46 : vector<8x8xf32> to vector<8x8xbf16>
    %49 = arith.truncf %47 : vector<8x8xf32> to vector<8x8xbf16>
    %cst_20 = arith.constant dense<0.000000e+00> : vector<8x8xf32>
    %50 = tpu.matmul %48, %49, %cst_20 {dimension_numbers = #tpu.dot_dimension_numbers<[1], [0], [0], [1], [0, 0, 1, 1], [], []>} : vector<8x8xbf16>, vector<8x8xbf16>, vector<8x8xf32> -> vector<8x8xf32>
    %cst_21 = arith.constant dense<0xFF800000> : vector<8xf32>
    %51 = vector.multi_reduction <maximumf>, %50, %cst_21 [1] : vector<8x8xf32> to vector<8xf32>
    %52 = vector.shape_cast %51 : vector<8xf32> to vector<8x1xf32>
    %53 = vector.broadcast %52 : vector<8x1xf32> to vector<8x8xf32>
    %54 = arith.subf %50, %53 : vector<8x8xf32>
    %55 = math.exp %54 : vector<8x8xf32>
    %cst_22 = arith.constant dense<0.000000e+00> : vector<8xf32>
    %56 = vector.multi_reduction <add>, %55, %cst_22 [1] : vector<8x8xf32> to vector<8xf32>
    %57 = vector.shape_cast %56 : vector<8xf32> to vector<8x1xf32>
    %58 = tpu.reciprocal %57 {approx = true} : vector<8x1xf32> -> vector<8x1xf32>
    %59 = vector.broadcast %58 : vector<8x1xf32> to vector<8x8xf32>
    %60 = arith.mulf %55, %59 : vector<8x8xf32>
    %61 = vector.extract_strided_slice %26 {offsets = [0, 8], sizes = [8, 8], strides = [1, 1]} : vector<8x32xf32> to vector<8x8xf32>
    %62 = arith.truncf %60 : vector<8x8xf32> to vector<8x8xbf16>
    %63 = arith.truncf %61 : vector<8x8xf32> to vector<8x8xbf16>
    %cst_23 = arith.constant dense<0.000000e+00> : vector<8x8xf32>
    %64 = tpu.matmul %62, %63, %cst_23 {dimension_numbers = #tpu.dot_dimension_numbers<[1], [0], [0], [1], [0, 0, 1, 1], [], []>} : vector<8x8xbf16>, vector<8x8xbf16>, vector<8x8xf32> -> vector<8x8xf32>
    %65 = vector.extract_strided_slice %23 {offsets = [0, 16], sizes = [8, 8], strides = [1, 1]} : vector<8x32xf32> to vector<8x8xf32>
    %66 = vector.extract_strided_slice %25 {offsets = [16, 0], sizes = [8, 8], strides = [1, 1]} : vector<32x8xf32> to vector<8x8xf32>
    %67 = arith.truncf %65 : vector<8x8xf32> to vector<8x8xbf16>
    %68 = arith.truncf %66 : vector<8x8xf32> to vector<8x8xbf16>
    %cst_24 = arith.constant dense<0.000000e+00> : vector<8x8xf32>
    %69 = tpu.matmul %67, %68, %cst_24 {dimension_numbers = #tpu.dot_dimension_numbers<[1], [0], [0], [1], [0, 0, 1, 1], [], []>} : vector<8x8xbf16>, vector<8x8xbf16>, vector<8x8xf32> -> vector<8x8xf32>
    %cst_25 = arith.constant dense<0xFF800000> : vector<8xf32>
    %70 = vector.multi_reduction <maximumf>, %69, %cst_25 [1] : vector<8x8xf32> to vector<8xf32>
    %71 = vector.shape_cast %70 : vector<8xf32> to vector<8x1xf32>
    %72 = vector.broadcast %71 : vector<8x1xf32> to vector<8x8xf32>
    %73 = arith.subf %69, %72 : vector<8x8xf32>
    %74 = math.exp %73 : vector<8x8xf32>
    %cst_26 = arith.constant dense<0.000000e+00> : vector<8xf32>
    %75 = vector.multi_reduction <add>, %74, %cst_26 [1] : vector<8x8xf32> to vector<8xf32>
    %76 = vector.shape_cast %75 : vector<8xf32> to vector<8x1xf32>
    %77 = tpu.reciprocal %76 {approx = true} : vector<8x1xf32> -> vector<8x1xf32>
    %78 = vector.broadcast %77 : vector<8x1xf32> to vector<8x8xf32>
    %79 = arith.mulf %74, %78 : vector<8x8xf32>
    %80 = vector.extract_strided_slice %26 {offsets = [0, 16], sizes = [8, 8], strides = [1, 1]} : vector<8x32xf32> to vector<8x8xf32>
    %81 = arith.truncf %79 : vector<8x8xf32> to vector<8x8xbf16>
    %82 = arith.truncf %80 : vector<8x8xf32> to vector<8x8xbf16>
    %cst_27 = arith.constant dense<0.000000e+00> : vector<8x8xf32>
    %83 = tpu.matmul %81, %82, %cst_27 {dimension_numbers = #tpu.dot_dimension_numbers<[1], [0], [0], [1], [0, 0, 1, 1], [], []>} : vector<8x8xbf16>, vector<8x8xbf16>, vector<8x8xf32> -> vector<8x8xf32>
    %84 = vector.extract_strided_slice %23 {offsets = [0, 24], sizes = [8, 8], strides = [1, 1]} : vector<8x32xf32> to vector<8x8xf32>
    %85 = vector.extract_strided_slice %25 {offsets = [24, 0], sizes = [8, 8], strides = [1, 1]} : vector<32x8xf32> to vector<8x8xf32>
    %86 = arith.truncf %84 : vector<8x8xf32> to vector<8x8xbf16>
    %87 = arith.truncf %85 : vector<8x8xf32> to vector<8x8xbf16>
    %cst_28 = arith.constant dense<0.000000e+00> : vector<8x8xf32>
    %88 = tpu.matmul %86, %87, %cst_28 {dimension_numbers = #tpu.dot_dimension_numbers<[1], [0], [0], [1], [0, 0, 1, 1], [], []>} : vector<8x8xbf16>, vector<8x8xbf16>, vector<8x8xf32> -> vector<8x8xf32>
    %cst_29 = arith.constant dense<0xFF800000> : vector<8xf32>
    %89 = vector.multi_reduction <maximumf>, %88, %cst_29 [1] : vector<8x8xf32> to vector<8xf32>
    %90 = vector.shape_cast %89 : vector<8xf32> to vector<8x1xf32>
    %91 = vector.broadcast %90 : vector<8x1xf32> to vector<8x8xf32>
    %92 = arith.subf %88, %91 : vector<8x8xf32>
    %93 = math.exp %92 : vector<8x8xf32>
    %cst_30 = arith.constant dense<0.000000e+00> : vector<8xf32>
    %94 = vector.multi_reduction <add>, %93, %cst_30 [1] : vector<8x8xf32> to vector<8xf32>
    %95 = vector.shape_cast %94 : vector<8xf32> to vector<8x1xf32>
    %96 = tpu.reciprocal %95 {approx = true} : vector<8x1xf32> -> vector<8x1xf32>
    %97 = vector.broadcast %96 : vector<8x1xf32> to vector<8x8xf32>
    %98 = arith.mulf %93, %97 : vector<8x8xf32>
    %99 = vector.extract_strided_slice %26 {offsets = [0, 24], sizes = [8, 8], strides = [1, 1]} : vector<8x32xf32> to vector<8x8xf32>
    %100 = arith.truncf %98 : vector<8x8xf32> to vector<8x8xbf16>
    %101 = arith.truncf %99 : vector<8x8xf32> to vector<8x8xbf16>
    %cst_31 = arith.constant dense<0.000000e+00> : vector<8x8xf32>
    %102 = tpu.matmul %100, %101, %cst_31 {dimension_numbers = #tpu.dot_dimension_numbers<[1], [0], [0], [1], [0, 0, 1, 1], [], []>} : vector<8x8xbf16>, vector<8x8xbf16>, vector<8x8xf32> -> vector<8x8xf32>
    %103 = tpu.concatenate %45, %64, %83, %102 in 1 : vector<8x8xf32>, vector<8x8xf32>, vector<8x8xf32>, vector<8x8xf32> -> vector<8x32xf32>
    %104 = vector.extract_strided_slice %20 {offsets = [8, 0], sizes = [8, 32], strides = [1, 1]} : vector<16x96xf32> to vector<8x32xf32>
    %cst_32 = arith.constant 0.353553385 : f32
    %105 = vector.broadcast %cst_32 : f32 to vector<8x32xf32>
    %106 = arith.mulf %104, %105 : vector<8x32xf32>
    %107 = vector.extract_strided_slice %20 {offsets = [8, 32], sizes = [8, 32], strides = [1, 1]} : vector<16x96xf32> to vector<8x32xf32>
    %108 = tpu.transpose %107, [1, 0] : vector<8x32xf32> -> vector<32x8xf32>
    %109 = vector.extract_strided_slice %20 {offsets = [8, 64], sizes = [8, 32], strides = [1, 1]} : vector<16x96xf32> to vector<8x32xf32>
    %110 = vector.extract_strided_slice %106 {offsets = [0, 0], sizes = [8, 8], strides = [1, 1]} : vector<8x32xf32> to vector<8x8xf32>
    %111 = vector.extract_strided_slice %108 {offsets = [0, 0], sizes = [8, 8], strides = [1, 1]} : vector<32x8xf32> to vector<8x8xf32>
    %112 = arith.truncf %110 : vector<8x8xf32> to vector<8x8xbf16>
    %113 = arith.truncf %111 : vector<8x8xf32> to vector<8x8xbf16>
    %cst_33 = arith.constant dense<0.000000e+00> : vector<8x8xf32>
    %114 = tpu.matmul %112, %113, %cst_33 {dimension_numbers = #tpu.dot_dimension_numbers<[1], [0], [0], [1], [0, 0, 1, 1], [], []>} : vector<8x8xbf16>, vector<8x8xbf16>, vector<8x8xf32> -> vector<8x8xf32>
    %cst_34 = arith.constant dense<0xFF800000> : vector<8xf32>
    %115 = vector.multi_reduction <maximumf>, %114, %cst_34 [1] : vector<8x8xf32> to vector<8xf32>
    %116 = vector.shape_cast %115 : vector<8xf32> to vector<8x1xf32>
    %117 = vector.broadcast %116 : vector<8x1xf32> to vector<8x8xf32>
    %118 = arith.subf %114, %117 : vector<8x8xf32>
    %119 = math.exp %118 : vector<8x8xf32>
    %cst_35 = arith.constant dense<0.000000e+00> : vector<8xf32>
    %120 = vector.multi_reduction <add>, %119, %cst_35 [1] : vector<8x8xf32> to vector<8xf32>
    %121 = vector.shape_cast %120 : vector<8xf32> to vector<8x1xf32>
    %122 = tpu.reciprocal %121 {approx = true} : vector<8x1xf32> -> vector<8x1xf32>
    %123 = vector.broadcast %122 : vector<8x1xf32> to vector<8x8xf32>
    %124 = arith.mulf %119, %123 : vector<8x8xf32>
    %125 = vector.extract_strided_slice %109 {offsets = [0, 0], sizes = [8, 8], strides = [1, 1]} : vector<8x32xf32> to vector<8x8xf32>
    %126 = arith.truncf %124 : vector<8x8xf32> to vector<8x8xbf16>
    %127 = arith.truncf %125 : vector<8x8xf32> to vector<8x8xbf16>
    %cst_36 = arith.constant dense<0.000000e+00> : vector<8x8xf32>
    %128 = tpu.matmul %126, %127, %cst_36 {dimension_numbers = #tpu.dot_dimension_numbers<[1], [0], [0], [1], [0, 0, 1, 1], [], []>} : vector<8x8xbf16>, vector<8x8xbf16>, vector<8x8xf32> -> vector<8x8xf32>
    %129 = vector.extract_strided_slice %106 {offsets = [0, 8], sizes = [8, 8], strides = [1, 1]} : vector<8x32xf32> to vector<8x8xf32>
    %130 = vector.extract_strided_slice %108 {offsets = [8, 0], sizes = [8, 8], strides = [1, 1]} : vector<32x8xf32> to vector<8x8xf32>
    %131 = arith.truncf %129 : vector<8x8xf32> to vector<8x8xbf16>
    %132 = arith.truncf %130 : vector<8x8xf32> to vector<8x8xbf16>
    %cst_37 = arith.constant dense<0.000000e+00> : vector<8x8xf32>
    %133 = tpu.matmul %131, %132, %cst_37 {dimension_numbers = #tpu.dot_dimension_numbers<[1], [0], [0], [1], [0, 0, 1, 1], [], []>} : vector<8x8xbf16>, vector<8x8xbf16>, vector<8x8xf32> -> vector<8x8xf32>
    %cst_38 = arith.constant dense<0xFF800000> : vector<8xf32>
    %134 = vector.multi_reduction <maximumf>, %133, %cst_38 [1] : vector<8x8xf32> to vector<8xf32>
    %135 = vector.shape_cast %134 : vector<8xf32> to vector<8x1xf32>
    %136 = vector.broadcast %135 : vector<8x1xf32> to vector<8x8xf32>
    %137 = arith.subf %133, %136 : vector<8x8xf32>
    %138 = math.exp %137 : vector<8x8xf32>
    %cst_39 = arith.constant dense<0.000000e+00> : vector<8xf32>
    %139 = vector.multi_reduction <add>, %138, %cst_39 [1] : vector<8x8xf32> to vector<8xf32>
    %140 = vector.shape_cast %139 : vector<8xf32> to vector<8x1xf32>
    %141 = tpu.reciprocal %140 {approx = true} : vector<8x1xf32> -> vector<8x1xf32>
    %142 = vector.broadcast %141 : vector<8x1xf32> to vector<8x8xf32>
    %143 = arith.mulf %138, %142 : vector<8x8xf32>
    %144 = vector.extract_strided_slice %109 {offsets = [0, 8], sizes = [8, 8], strides = [1, 1]} : vector<8x32xf32> to vector<8x8xf32>
    %145 = arith.truncf %143 : vector<8x8xf32> to vector<8x8xbf16>
    %146 = arith.truncf %144 : vector<8x8xf32> to vector<8x8xbf16>
    %cst_40 = arith.constant dense<0.000000e+00> : vector<8x8xf32>
    %147 = tpu.matmul %145, %146, %cst_40 {dimension_numbers = #tpu.dot_dimension_numbers<[1], [0], [0], [1], [0, 0, 1, 1], [], []>} : vector<8x8xbf16>, vector<8x8xbf16>, vector<8x8xf32> -> vector<8x8xf32>
    %148 = vector.extract_strided_slice %106 {offsets = [0, 16], sizes = [8, 8], strides = [1, 1]} : vector<8x32xf32> to vector<8x8xf32>
    %149 = vector.extract_strided_slice %108 {offsets = [16, 0], sizes = [8, 8], strides = [1, 1]} : vector<32x8xf32> to vector<8x8xf32>
    %150 = arith.truncf %148 : vector<8x8xf32> to vector<8x8xbf16>
    %151 = arith.truncf %149 : vector<8x8xf32> to vector<8x8xbf16>
    %cst_41 = arith.constant dense<0.000000e+00> : vector<8x8xf32>
    %152 = tpu.matmul %150, %151, %cst_41 {dimension_numbers = #tpu.dot_dimension_numbers<[1], [0], [0], [1], [0, 0, 1, 1], [], []>} : vector<8x8xbf16>, vector<8x8xbf16>, vector<8x8xf32> -> vector<8x8xf32>
    %cst_42 = arith.constant dense<0xFF800000> : vector<8xf32>
    %153 = vector.multi_reduction <maximumf>, %152, %cst_42 [1] : vector<8x8xf32> to vector<8xf32>
    %154 = vector.shape_cast %153 : vector<8xf32> to vector<8x1xf32>
    %155 = vector.broadcast %154 : vector<8x1xf32> to vector<8x8xf32>
    %156 = arith.subf %152, %155 : vector<8x8xf32>
    %157 = math.exp %156 : vector<8x8xf32>
    %cst_43 = arith.constant dense<0.000000e+00> : vector<8xf32>
    %158 = vector.multi_reduction <add>, %157, %cst_43 [1] : vector<8x8xf32> to vector<8xf32>
    %159 = vector.shape_cast %158 : vector<8xf32> to vector<8x1xf32>
    %160 = tpu.reciprocal %159 {approx = true} : vector<8x1xf32> -> vector<8x1xf32>
    %161 = vector.broadcast %160 : vector<8x1xf32> to vector<8x8xf32>
    %162 = arith.mulf %157, %161 : vector<8x8xf32>
    %163 = vector.extract_strided_slice %109 {offsets = [0, 16], sizes = [8, 8], strides = [1, 1]} : vector<8x32xf32> to vector<8x8xf32>
    %164 = arith.truncf %162 : vector<8x8xf32> to vector<8x8xbf16>
    %165 = arith.truncf %163 : vector<8x8xf32> to vector<8x8xbf16>
    %cst_44 = arith.constant dense<0.000000e+00> : vector<8x8xf32>
    %166 = tpu.matmul %164, %165, %cst_44 {dimension_numbers = #tpu.dot_dimension_numbers<[1], [0], [0], [1], [0, 0, 1, 1], [], []>} : vector<8x8xbf16>, vector<8x8xbf16>, vector<8x8xf32> -> vector<8x8xf32>
    %167 = vector.extract_strided_slice %106 {offsets = [0, 24], sizes = [8, 8], strides = [1, 1]} : vector<8x32xf32> to vector<8x8xf32>
    %168 = vector.extract_strided_slice %108 {offsets = [24, 0], sizes = [8, 8], strides = [1, 1]} : vector<32x8xf32> to vector<8x8xf32>
    %169 = arith.truncf %167 : vector<8x8xf32> to vector<8x8xbf16>
    %170 = arith.truncf %168 : vector<8x8xf32> to vector<8x8xbf16>
    %cst_45 = arith.constant dense<0.000000e+00> : vector<8x8xf32>
    %171 = tpu.matmul %169, %170, %cst_45 {dimension_numbers = #tpu.dot_dimension_numbers<[1], [0], [0], [1], [0, 0, 1, 1], [], []>} : vector<8x8xbf16>, vector<8x8xbf16>, vector<8x8xf32> -> vector<8x8xf32>
    %cst_46 = arith.constant dense<0xFF800000> : vector<8xf32>
    %172 = vector.multi_reduction <maximumf>, %171, %cst_46 [1] : vector<8x8xf32> to vector<8xf32>
    %173 = vector.shape_cast %172 : vector<8xf32> to vector<8x1xf32>
    %174 = vector.broadcast %173 : vector<8x1xf32> to vector<8x8xf32>
    %175 = arith.subf %171, %174 : vector<8x8xf32>
    %176 = math.exp %175 : vector<8x8xf32>
    %cst_47 = arith.constant dense<0.000000e+00> : vector<8xf32>
    %177 = vector.multi_reduction <add>, %176, %cst_47 [1] : vector<8x8xf32> to vector<8xf32>
    %178 = vector.shape_cast %177 : vector<8xf32> to vector<8x1xf32>
    %179 = tpu.reciprocal %178 {approx = true} : vector<8x1xf32> -> vector<8x1xf32>
    %180 = vector.broadcast %179 : vector<8x1xf32> to vector<8x8xf32>
    %181 = arith.mulf %176, %180 : vector<8x8xf32>
    %182 = vector.extract_strided_slice %109 {offsets = [0, 24], sizes = [8, 8], strides = [1, 1]} : vector<8x32xf32> to vector<8x8xf32>
    %183 = arith.truncf %181 : vector<8x8xf32> to vector<8x8xbf16>
    %184 = arith.truncf %182 : vector<8x8xf32> to vector<8x8xbf16>
    %cst_48 = arith.constant dense<0.000000e+00> : vector<8x8xf32>
    %185 = tpu.matmul %183, %184, %cst_48 {dimension_numbers = #tpu.dot_dimension_numbers<[1], [0], [0], [1], [0, 0, 1, 1], [], []>} : vector<8x8xbf16>, vector<8x8xbf16>, vector<8x8xf32> -> vector<8x8xf32>
    %186 = tpu.concatenate %128, %147, %166, %185 in 1 : vector<8x8xf32>, vector<8x8xf32>, vector<8x8xf32>, vector<8x8xf32> -> vector<8x32xf32>
    %187 = tpu.concatenate %103, %186 in 0 : vector<8x32xf32>, vector<8x32xf32> -> vector<16x32xf32>
    %c0_49 = arith.constant 0 : index
    %c0_50 = arith.constant 0 : index
    %c0_51 = arith.constant 0 : index
    %188 = vector.load %arg5[%c0_49, %c0_50, %c0_51] : memref<1x32x32xbf16, #tpu.memory_space<vmem>>, vector<1x32x32xbf16>
    %189 = vector.shape_cast %188 : vector<1x32x32xbf16> to vector<32x32xbf16>
    %190 = arith.truncf %187 : vector<16x32xf32> to vector<16x32xbf16>
    %cst_52 = arith.constant dense<0.000000e+00> : vector<16x32xf32>
    %191 = tpu.matmul %190, %189, %cst_52 {dimension_numbers = #tpu.dot_dimension_numbers<[1], [0], [0], [1], [0, 0, 1, 1], [], []>} : vector<16x32xbf16>, vector<32x32xbf16>, vector<16x32xf32> -> vector<16x32xf32>
    %192 = vector.extract_strided_slice %4 {offsets = [1, 0], sizes = [1, 32], strides = [1, 1]} : vector<8x32xf32> to vector<1x32xf32>
    %193 = vector.broadcast %192 : vector<1x32xf32> to vector<16x32xf32>
    %194 = arith.addf %191, %193 : vector<16x32xf32>
    %195 = arith.addf %12, %194 : vector<16x32xf32>
    %196 = vector.extract_strided_slice %4 {offsets = [3, 0], sizes = [1, 32], strides = [1, 1]} : vector<8x32xf32> to vector<1x32xf32>
    %197 = vector.extract_strided_slice %4 {offsets = [4, 0], sizes = [1, 32], strides = [1, 1]} : vector<8x32xf32> to vector<1x32xf32>
    %cst_53 = arith.constant dense<0.000000e+00> : vector<16xf32>
    %198 = vector.multi_reduction <add>, %195, %cst_53 [1] : vector<16x32xf32> to vector<16xf32>
    %199 = vector.shape_cast %198 : vector<16xf32> to vector<16x1xf32>
    %cst_54 = arith.constant 3.125000e-02 : f32
    %200 = vector.broadcast %cst_54 : f32 to vector<16x1xf32>
    %201 = arith.mulf %199, %200 : vector<16x1xf32>
    %202 = vector.broadcast %201 : vector<16x1xf32> to vector<16x32xf32>
    %203 = arith.subf %195, %202 : vector<16x32xf32>
    %204 = arith.mulf %203, %203 : vector<16x32xf32>
    %cst_55 = arith.constant dense<0.000000e+00> : vector<16xf32>
    %205 = vector.multi_reduction <add>, %204, %cst_55 [1] : vector<16x32xf32> to vector<16xf32>
    %206 = vector.shape_cast %205 : vector<16xf32> to vector<16x1xf32>
    %cst_56 = arith.constant 3.125000e-02 : f32
    %207 = vector.broadcast %cst_56 : f32 to vector<16x1xf32>
    %208 = arith.mulf %206, %207 : vector<16x1xf32>
    %cst_57 = arith.constant 9.99999974E-6 : f32
    %209 = vector.broadcast %cst_57 : f32 to vector<16x1xf32>
    %210 = arith.addf %208, %209 : vector<16x1xf32>
    %211 = math.rsqrt %210 : vector<16x1xf32>
    %212 = vector.broadcast %211 : vector<16x1xf32> to vector<16x32xf32>
    %213 = arith.mulf %203, %212 : vector<16x32xf32>
    %214 = vector.broadcast %196 : vector<1x32xf32> to vector<16x32xf32>
    %215 = arith.mulf %213, %214 : vector<16x32xf32>
    %216 = vector.broadcast %197 : vector<1x32xf32> to vector<16x32xf32>
    %217 = arith.addf %215, %216 : vector<16x32xf32>
    %c0_58 = arith.constant 0 : index
    %c0_59 = arith.constant 0 : index
    %c0_60 = arith.constant 0 : index
    %218 = vector.load %arg6[%c0_58, %c0_59, %c0_60] : memref<1x32x128xbf16, #tpu.memory_space<vmem>>, vector<1x32x128xbf16>
    %219 = vector.shape_cast %218 : vector<1x32x128xbf16> to vector<32x128xbf16>
    %220 = arith.truncf %217 : vector<16x32xf32> to vector<16x32xbf16>
    %cst_61 = arith.constant dense<0.000000e+00> : vector<16x128xf32>
    %221 = tpu.matmul %220, %219, %cst_61 {dimension_numbers = #tpu.dot_dimension_numbers<[1], [0], [0], [1], [0, 0, 1, 1], [], []>} : vector<16x32xbf16>, vector<32x128xbf16>, vector<16x128xf32> -> vector<16x128xf32>
    %c0_62 = arith.constant 0 : index
    %c0_63 = arith.constant 0 : index
    %c0_64 = arith.constant 0 : index
    %222 = vector.load %arg9[%c0_62, %c0_63, %c0_64] : memref<1x1x128xf32, #tpu.memory_space<vmem>>, vector<1x1x128xf32>
    %223 = vector.shape_cast %222 : vector<1x1x128xf32> to vector<1x128xf32>
    %224 = vector.broadcast %223 : vector<1x128xf32> to vector<16x128xf32>
    %225 = arith.addf %221, %224 : vector<16x128xf32>
    %cst_65 = arith.constant 5.000000e-01 : f32
    %226 = vector.broadcast %cst_65 : f32 to vector<16x128xf32>
    %227 = arith.mulf %226, %225 : vector<16x128xf32>
    %cst_66 = arith.constant 4.471500e-02 : f32
    %228 = vector.broadcast %cst_66 : f32 to vector<16x128xf32>
    %229 = arith.mulf %228, %225 : vector<16x128xf32>
    %230 = arith.mulf %229, %225 : vector<16x128xf32>
    %231 = arith.mulf %230, %225 : vector<16x128xf32>
    %232 = arith.addf %225, %231 : vector<16x128xf32>
    %cst_67 = arith.constant 0.797884583 : f32
    %233 = vector.broadcast %cst_67 : f32 to vector<16x128xf32>
    %234 = arith.mulf %233, %232 : vector<16x128xf32>
    %235 = math.tanh %234 : vector<16x128xf32>
    %cst_68 = arith.constant 1.000000e+00 : f32
    %236 = vector.broadcast %cst_68 : f32 to vector<16x128xf32>
    %237 = arith.addf %236, %235 : vector<16x128xf32>
    %238 = arith.mulf %227, %237 : vector<16x128xf32>
    %c0_69 = arith.constant 0 : index
    %c0_70 = arith.constant 0 : index
    %c0_71 = arith.constant 0 : index
    %239 = vector.load %arg7[%c0_69, %c0_70, %c0_71] : memref<1x128x32xbf16, #tpu.memory_space<vmem>>, vector<1x128x32xbf16>
    %240 = vector.shape_cast %239 : vector<1x128x32xbf16> to vector<128x32xbf16>
    %241 = arith.truncf %238 : vector<16x128xf32> to vector<16x128xbf16>
    %cst_72 = arith.constant dense<0.000000e+00> : vector<16x32xf32>
    %242 = tpu.matmul %241, %240, %cst_72 {dimension_numbers = #tpu.dot_dimension_numbers<[1], [0], [0], [1], [0, 0, 1, 1], [], []>} : vector<16x128xbf16>, vector<128x32xbf16>, vector<16x32xf32> -> vector<16x32xf32>
    %243 = vector.extract_strided_slice %4 {offsets = [2, 0], sizes = [1, 32], strides = [1, 1]} : vector<8x32xf32> to vector<1x32xf32>
    %244 = vector.broadcast %243 : vector<1x32xf32> to vector<16x32xf32>
    %245 = arith.addf %242, %244 : vector<16x32xf32>
    %246 = arith.addf %217, %245 : vector<16x32xf32>
    %247 = vector.extract_strided_slice %4 {offsets = [5, 0], sizes = [1, 32], strides = [1, 1]} : vector<8x32xf32> to vector<1x32xf32>
    %248 = vector.extract_strided_slice %4 {offsets = [6, 0], sizes = [1, 32], strides = [1, 1]} : vector<8x32xf32> to vector<1x32xf32>
    %cst_73 = arith.constant dense<0.000000e+00> : vector<16xf32>
    %249 = vector.multi_reduction <add>, %246, %cst_73 [1] : vector<16x32xf32> to vector<16xf32>
    %250 = vector.shape_cast %249 : vector<16xf32> to vector<16x1xf32>
    %cst_74 = arith.constant 3.125000e-02 : f32
    %251 = vector.broadcast %cst_74 : f32 to vector<16x1xf32>
    %252 = arith.mulf %250, %251 : vector<16x1xf32>
    %253 = vector.broadcast %252 : vector<16x1xf32> to vector<16x32xf32>
    %254 = arith.subf %246, %253 : vector<16x32xf32>
    %255 = arith.mulf %254, %254 : vector<16x32xf32>
    %cst_75 = arith.constant dense<0.000000e+00> : vector<16xf32>
    %256 = vector.multi_reduction <add>, %255, %cst_75 [1] : vector<16x32xf32> to vector<16xf32>
    %257 = vector.shape_cast %256 : vector<16xf32> to vector<16x1xf32>
    %cst_76 = arith.constant 3.125000e-02 : f32
    %258 = vector.broadcast %cst_76 : f32 to vector<16x1xf32>
    %259 = arith.mulf %257, %258 : vector<16x1xf32>
    %cst_77 = arith.constant 9.99999974E-6 : f32
    %260 = vector.broadcast %cst_77 : f32 to vector<16x1xf32>
    %261 = arith.addf %259, %260 : vector<16x1xf32>
    %262 = math.rsqrt %261 : vector<16x1xf32>
    %263 = vector.broadcast %262 : vector<16x1xf32> to vector<16x32xf32>
    %264 = arith.mulf %254, %263 : vector<16x32xf32>
    %265 = vector.broadcast %247 : vector<1x32xf32> to vector<16x32xf32>
    %266 = arith.mulf %264, %265 : vector<16x32xf32>
    %267 = vector.broadcast %248 : vector<1x32xf32> to vector<16x32xf32>
    %268 = arith.addf %266, %267 : vector<16x32xf32>
    %c0_78 = arith.constant 0 : index
    %c0_79 = arith.constant 0 : index
    %269 = vector.load %arg11[%c0_78, %c0_79] : memref<16x32xf32, #tpu.memory_space<vmem>>, vector<16x32xf32>
    tpu.vector_store %arg11[%c0_78, %c0_79], %268 {strides = array<i32>} : memref<16x32xf32, #tpu.memory_space<vmem>>, vector<16x32xf32>,
    return
  }
  func.func @transform_0(%arg0: i32, %arg1: i32) -> (i32, i32) {
    %c0_i32 = arith.constant 0 : i32
    %c0_i32_0 = arith.constant 0 : i32
    return %arg0, %c0_i32 : i32, i32
  }
  func.func @transform_1(%arg0: i32, %arg1: i32) -> (i32, i32, i32) {
    %c0_i32 = arith.constant 0 : i32
    %c0_i32_0 = arith.constant 0 : i32
    %c0_i32_1 = arith.constant 0 : i32
    return %arg1, %c0_i32, %c0_i32_0 : i32, i32, i32
  }
  func.func @transform_2(%arg0: i32, %arg1: i32) -> (i32, i32, i32) {
    %c0_i32 = arith.constant 0 : i32
    %c0_i32_0 = arith.constant 0 : i32
    %c0_i32_1 = arith.constant 0 : i32
    return %arg1, %c0_i32, %c0_i32_0 : i32, i32, i32
  }
  func.func @transform_3(%arg0: i32, %arg1: i32) -> (i32, i32, i32) {
    %c0_i32 = arith.constant 0 : i32
    %c0_i32_0 = arith.constant 0 : i32
    %c0_i32_1 = arith.constant 0 : i32
    return %arg1, %c0_i32, %c0_i32_0 : i32, i32, i32
  }
  func.func @transform_4(%arg0: i32, %arg1: i32) -> (i32, i32, i32) {
    %c0_i32 = arith.constant 0 : i32
    %c0_i32_0 = arith.constant 0 : i32
    %c0_i32_1 = arith.constant 0 : i32
    return %arg1, %c0_i32, %c0_i32_0 : i32, i32, i32
  }
  func.func @transform_5(%arg0: i32, %arg1: i32) -> (i32, i32, i32) {
    %c0_i32 = arith.constant 0 : i32
    %c0_i32_0 = arith.constant 0 : i32
    %c0_i32_1 = arith.constant 0 : i32
    return %arg1, %c0_i32, %c0_i32_0 : i32, i32, i32
  }
  func.func @transform_6(%arg0: i32, %arg1: i32) -> (i32, i32, i32) {
    %c0_i32 = arith.constant 0 : i32
    %c0_i32_0 = arith.constant 0 : i32
    %c0_i32_1 = arith.constant 0 : i32
    return %arg1, %c0_i32, %c0_i32_0 : i32, i32, i32
  }
  func.func @transform_7(%arg0: i32, %arg1: i32) -> (i32, i32, i32) {
    %c0_i32 = arith.constant 0 : i32
    %c0_i32_0 = arith.constant 0 : i32
    %c0_i32_1 = arith.constant 0 : i32
    return %arg1, %c0_i32, %c0_i32_0 : i32, i32, i32
  }
  func.func @transform_8(%arg0: i32, %arg1: i32) -> (i32, i32, i32) {
    %c0_i32 = arith.constant 0 : i32
    %c0_i32_0 = arith.constant 0 : i32
    %c0_i32_1 = arith.constant 0 : i32
    return %arg1, %c0_i32, %c0_i32_0 : i32, i32, i32
  }
  func.func @transform_9(%arg0: i32, %arg1: i32) -> (i32, i32) {
    %c0_i32 = arith.constant 0 : i32
    %c0_i32_0 = arith.constant 0 : i32
    return %arg0, %c0_i32 : i32, i32
  }
}

</mosaic_0001>

<bundles_post_ra>
// kernel: semantic_forward.2
= control target key start
LH: loop header
LB: loop body
LE: loop exit
PB: predicated region body
PF: predicated region fallthrough
CT: control target
= control target key end

     0   :  { %8 = vsyncpa [#allocation3], 0  ;;  %s1076_s0 = inlined_call_operand.vmem [shape: f32[1,16], index: 0, kind: input, shape index: {}]   ;;  %s1077_s1 = inlined_call_operand.hbm [shape: bf16[2,16,1024], index: 1, kind: input, shape index: {}]   ;;  %s1078_s2 = inlined_call_operand.hbm [shape: f32[2,1,1024], index: 2, kind: input, shape index: {}]   ;;  %s1079_s3 = inlined_call_operand.vmem [shape: bf16[2,1,1024], index: 3, kind: output, shape index: {}]  }
   0x1   :  { %10 = vsyncpa [#allocation3 + $0x1], 0 }
   0x2   :  { %11 = vsyncpa [#allocation5], 0 }
   0x3   :  { %13 = vsyncpa [#allocation5 + $0x1], 0  ;;  %s890_s12 = smov 0   ;;  %s892_s13 = smov 0  }
   0x4   :  { %s894_s14 = smov 0   ;;  %s896_s15 = smov 0  }
   0x5   :  { %s898_s16 = smov 0   ;;  %s900_s17 = smov 0  }
   0x6 LB: > { %s626_s18 = sadd.s32 4294967295, %s866_s17   ;;  %s31_s19 = sadd.s32 1, %s862_s16  ;;  %s866_s17 = sphi %s900_s17, %s19_s17   ;;  %s862_s16 = sphi %s898_s16, %s1099_s16   ;;  %s858_s15 = sphi %s896_s15, %s1098_s15   ;;  %s854_s14 = sphi %s894_s14, %s1097_s14   ;;  %s850_s13 = sphi %s892_s13, %s1096_s13   ;;  %s846_s12 = sphi %s890_s12, %s1095_s12  }
   0x7   : > { %p33_p0 = scmp.ge.s32.totalorder %s31_s19, 2  ;;  %s61_s20 = sadd.s32 1, %s854_s14 }
   0x8   : > { %p68_p1 = scmp.ne.s32.totalorder %s854_s14, %s850_s13  ;;  %p69_p2 = scmp.eq.s32.totalorder %s866_s17, 0 }
   0x9   : > { %s1101_s19 = smov (%p33_p0, %s31_s19), 0  ;;  %p74_p4 = scmp.ne.s32.totalorder %s850_s13, %s846_s12 }
   0xa   : > { %p926_p3 = por %p69_p2, %p68_p1  ;;  %s56_s22 = ssub.s32 %s862_s16, %s1101_s19 }
   0xb   : > { %p75_p5 = scmp.eq.s32.totalorder %s626_s18, 0  ;;  %p59_p6 = scmp.eq.s32.totalorder %s56_s22, 0 }
   0xc   : > { %p701_p8 = scmp.lt.s32.totalorder %s866_s17, 2  ;;  %s157_s25 = sand.u32 1, %s854_s14  }
   0xd   : > { %p933_p7 = por %p75_p5, %p74_p4  ;;  %s681_s26 = sshll.u32 %s862_s16, 6 }
   0xe   : > { %s939_s24 = scalar_select %p59_p6, %s854_s14, %s61_s20  }
   0xf   : > { %s630_s27 = sshll.u32 %s157_s25, 6  ;;  %s168_s30 = scalar_lea.hbm %s1077_s1, %s681_s26 }
  0x10   : > { %s169_s4 = sshll.u32 %s168_s30, 4  ;;  %s161_s5 = scalar_lea.vmem [#allocation2], %s630_s27  ;;  %s170_s4 = int_to_ptr.hbm [resolvable:$true] %s169_s4 }
  0x11   : > { %s171_s6 = sshll.u32 %s161_s5, 4  ;;  %p948_p9 = pnand %p701_p8, %p926_p3  ;;  %s172_s6 = int_to_ptr.vmem [resolvable:$true] %s171_s6 }
  0x12   : > { %p635_p10 = scmp.ge.s32.totalorder %s866_s17, 1  ;;  %p200_p11 = scmp.lt.s32.totalorder %s866_s17, 3 }
  0x13   : > { %s158_s8 = scalar_lea.sflag [#allocation3], %s157_s25  ;;  %s868_s9 = smov 512  }
  0x14   : > { %s869_s10 = smov 32   ;;  %p201_p12 = pnand %p635_p10, %p200_p11 }
  0x15   : > { %697 = dma.hbm_to_vmem [thread:$0]  (!%p948_p9), %s170_s4, 1024, %s172_s6, %s158_s8, %s868_s9, %s868_s9, %s869_s10  }
  0x16   : > { %s633_s11 = sshll.u32 %s157_s25, 3  ;;  %s634_s12 = sshll.u32 %s862_s16, 3 }
  0x17   : > { %s191_s21 = scalar_lea.hbm %s1078_s2, %s634_s12  ;;  %s185_s26 = scalar_lea.vmem [#allocation4], %s633_s11 }
  0x18   : > { %s193_s22 = sshll.u32 %s191_s21, 4  ;;  %s195_s27 = sshll.u32 %s185_s26, 4  ;;  %s194_s22 = int_to_ptr.hbm [resolvable:$true] %s193_s22  ;;  %s196_s27 = int_to_ptr.vmem [resolvable:$true] %s195_s27 }
  0x19   : > { %s182_s28 = scalar_lea.sflag [#allocation5], %s157_s25  ;;  %204 = sbr.rel (%p201_p12) target bundleno = 202 (0xca), region = 32 }
  0x1a   : > { %700 = dma.hbm_to_vmem [thread:$0]  (!%p948_p9), %s194_s22, 128, %s196_s27, %s182_s28  }
  0x1b   : > { %s206_s29 = sand.u32 (!%p201_p12), 1, %s850_s13  }
  0x1c   : > { %s636_s30 = sshll.u32 (!%p201_p12), %s206_s29, 6  ;;  %s207_s4 = scalar_lea.sflag (!%p201_p12), [#allocation3], %s206_s29 }
  0x1d   : > { %s963_s5 = scalar_lea.vmem (!%p201_p12), [#allocation2], %s636_s30 }
  0x1e   : > { %837 = dma.done.wait (%p933_p7), %s207_s4, 1024  }
  0x1f   : > { %839 = vsyncadd (%p933_p7), %s207_s4, 4294966272  ;;  %s637_s6 = sshll.u32 %s206_s29, 3  ;;  %s217_s8 = scalar_lea.sflag [#allocation5], %s206_s29 }
  0x20   : > { %s969_s9 = scalar_lea.vmem [#allocation4], %s637_s6 }
  0x21   : > { %841 = dma.done.wait (%p933_p7), %s217_s8, 128  }
  0x22   : > { %843 = vsyncadd (%p933_p7), %s217_s8, 4294967168  ;;  %vm332_vm0 = vcmask 130048   ;;  %v641_v0 = vld [vmem:[%s963_s5] sm:$0xf]  ;;  %v682_v2 = vld [vmem:[%s963_s5 + $0x4] sm:$0xf] }
  0x23   : > { %v686_v1 = vld [vmem:[%s963_s5 + $0x1c] sm:$0xf0]  ;;  %v643_v4 = vld [vmem:[%s963_s5 + $0x20] sm:$0xf0]  ;;  %v649_v5 = vld [vmem:[%s963_s5 + $0x8] sm:$0xf] }
  0x24   : > { %v642_v3 = vor.u32 %v686_v1, %v641_v0  ;;  %v687_v6 = vld [vmem:[%s963_s5 + $0x24] sm:$0xf0]  ;;  %v646_v7 = vor.u32 %v682_v2, %v643_v4  ;;  %v683_v9 = vld [vmem:[%s963_s5 + $0xc] sm:$0xf]  ;;  %v264_v11 = vld [vmem:[%s1076_s0] sm:$0x1] }
  0x25   : > { %v650_v8 = vor.u32 %v687_v6, %v649_v5  ;;  %v651_v10 = vld [vmem:[%s963_s5 + $0x28] sm:$0xf0]  ;;  %v273_v13 = vpack.c.bf16 %v264_v11, %v264_v11  ;;  %v665_v14 = vld [vmem:[%s963_s5 + $0x18] sm:$0xf]  ;;  %v685_v16 = vld [vmem:[%s963_s5 + $0x1c] sm:$0xf] }
  0x26   : > { %343 = vmatpush.bf16.msra.mxu0 %v642_v3  ;;  %v654_v12 = vor.u32 %v683_v9, %v651_v10  ;;  %v689_v15 = vld [vmem:[%s963_s5 + $0x34] sm:$0xf0]  ;;  %356 = vmatpush.bf16.msra.mxu1 %v646_v7  ;;  %v667_v18 = vld [vmem:[%s963_s5 + $0x38] sm:$0xf0]  ;;  %v657_v19 = vld [vmem:[%s963_s5 + $0x10] sm:$0xf] }
  0x27   : > { %369 = vmatpush.bf16.msra.mxu2 %v650_v8  ;;  %v666_v17 = vor.u32 %v689_v15, %v665_v14  ;;  %v688_v20 = vld [vmem:[%s963_s5 + $0x2c] sm:$0xf0]  ;;  %v670_v21 = vor.u32 %v685_v16, %v667_v18  ;;  %v684_v23 = vld [vmem:[%s963_s5 + $0x14] sm:$0xf]  ;;  %vm479_vm1 = vsmask.f32 256 }
  0x28   : > { %382 = vmatpush.bf16.msra.mxu3 %v654_v12  ;;  %v658_v22 = vor.u32 %v688_v20, %v657_v19  ;;  %v659_v24 = vld [vmem:[%s963_s5 + $0x30] sm:$0xf0]  ;;  %vm481_vm2 = vcmask 1041409   ;;  %vm482_vm3 = vsmask.f32 1280  ;;  %vm455_vm4 = vcmask 1040384  }
  0x29   : > { %671 = vmatmul.msk.bf16.vlgmr.msra.gmra.mxu0 %vm332_vm0, %v273_v13  ;;  %v662_v25 = vor.u32 %v684_v23, %v659_v24  ;;  %672 = vmatmul.msk.bf16.vlgmr.msra.gmra.mxu1 %vm332_vm0, %v273_v13  ;;  %vm480_vm5 = vmand %vm455_vm4, %vm479_vm1  ;;  %vm486_vm7 = vsmask.f32 2304  ;;  %vm459_vm9 = vcmask 1042434   ;;  %vm489_vm11 = vcmask 1043459   ;;  %v274_v32 = vld [vmem:[%s969_s9] sm:$0xff]  ;;  %p255_p13 = scmp.lt.s32.totalorder %s858_s15, 1 }
  0x2a   : > { %673 = vmatmul.msk.bf16.vlgmr.msra.gmra.mxu2 %vm332_vm0, %v273_v13  ;;  %395 = vmatpush.bf16.msrb.mxu0 %v658_v22  ;;  %vm483_vm6 = vmand %vm481_vm2, %vm482_vm3  ;;  %vm490_vm12 = vsmask.f32 3328  ;;  %v318_v34 = vperm.slane %v274_v32, 2  ;;  %v319_v35 = vperm.slane %v274_v32, 3  ;;  %v320_v37 = vperm.slane %v274_v32, 4 }
  0x2b   : > { %421 = vmatpush.bf16.msrb.mxu2 %v666_v17  ;;  %674 = vmatmul.msk.bf16.vlgmr.msra.gmra.mxu3 %vm332_vm0, %v273_v13  ;;  %vm484_vm8 = vmor %vm483_vm6, %vm480_vm5  ;;  %vm465_vm15 = vcmask 1044484   ;;  %v321_v38 = vperm.slane %v274_v32, 5  ;;  %v316_v39 = vperm.slane %v274_v32, 0  ;;  %v317_v40 = vperm.slane %v274_v32, 1  ;;  %s1103_s15 = smov (!%p255_p13, %s858_s15), 1 }
  0x2c   : > { %434 = vmatpush.bf16.msrb.mxu3 %v670_v21  ;;  %408 = vmatpush.bf16.msrb.mxu1 %v662_v25  ;;  %vm487_vm10 = vmand %vm459_vm9, %vm486_vm7  ;;  %vm497_vm3 = vcmask 1045509   ;;  %vm498_vm5 = vsmask.f32 5376  ;;  %v322_v53 = vperm.slane %v274_v32, 6  ;;  %v323_v56 = vperm.slane %v274_v32, 7  ;;  %s638_s7 = sshll.u32 %s1103_s15, 3 }
  0x2d   : > { %vm1005_vm13 = vmor %vm487_vm10, %vm484_vm8  ;;  %vm469_vm8 = vcmask 1046534   ;;  %vm502_vm10 = vsmask.f32 6400  ;;  %s261_s12 = scalar_lea.vmem %s1079_s3, %s638_s7 }
  0x2e   : > { %vm1009_vm14 = vmand %vm489_vm11, %vm490_vm12  ;;  %v509_v14 = vld [vmem:[%s261_s12] sm:$0xff] }
  0x2f   : > { %vm492_vm1 = vmor %vm1009_vm14, %vm1005_vm13  ;;  %vm505_vm13 = vcmask 1047559   ;;  %vm506_vm14 = vsmask.f32 7424 }
  0x30   : > { %vm1023_vm7 = vmand %vm497_vm3, %vm498_vm5  ;;  %vm475_vm5 = vcmask 1043456  }
  0x31   : > { %vm503_vm12 = vmand %vm469_vm8, %vm502_vm10 }
  0x32   : > { %vm1046_vm3 = vmand %vm505_vm13, %vm506_vm14 }
  0x39   : > { %675 = vmatmul.msk.bf16.vlgmr.msrb.gmra.mxu0 %vm332_vm0, %v273_v13  ;;  %676 = vmatmul.msk.bf16.vlgmr.msrb.gmra.mxu1 %vm332_vm0, %v273_v13 }
  0x3a   : > { %677 = vmatmul.msk.bf16.vlgmr.msrb.gmra.mxu2 %vm332_vm0, %v273_v13 }
  0x3b   : > { %678 = vmatmul.msk.bf16.vlgmr.msrb.gmra.mxu3 %vm332_vm0, %v273_v13  ;;  %vm494_vm0 = vsmask.f32 4352 }
  0x3c   : > { %vm495_vm2 = vmand %vm465_vm15, %vm494_vm0 }
  0x3d   : > { %vm1019_vm6 = vmor %vm495_vm2, %vm492_vm1  ;;  %vm463_vm1 = vcmask 1041408   ;;  %vm473_vm2 = vcmask 1045508  }
  0x3e   : > { %vm500_vm11 = vmor %vm1023_vm7, %vm1019_vm6 }
  0x3f   : > { %vm1038_vm0 = vmor %vm503_vm12, %vm500_vm11 }
  0x40   : > { %vm508_vm6 = vmor %vm1046_vm3, %vm1038_vm0 }
  0xa6   : > { %v345_v26 = vpop.f32.mrf.mxu0  ;;  %v358_v27 = vpop.f32.mrf.mxu1 }
  0xa7   : > { %v346_v49 = vadd.f32 %v345_v26, %v316_v39  ;;  %v359_v50 = vadd.f32 %v358_v27, %v317_v40 }
  0xa9   : > { %v440_v57 = vpack.c.bf16 %v359_v50, %v346_v49 }
  0xab   : > { %v448_v4 = vrot.slane %v440_v57, 3 }
  0xad   : > { %v371_v28 = vpop.f32.mrf.mxu2  ;;  %v458_v12 = vsel %vm455_vm4, %v440_v57, %v448_v4 }
  0xae   : > { %v384_v29 = vpop.f32.mrf.mxu3  ;;  %v347_v30 = vpop.f32.mrf.mxu0  ;;  %v372_v42 = vadd.f32 %v371_v28, %v318_v34 }
  0xaf   : > { %v360_v31 = vpop.f32.mrf.mxu1  ;;  %v385_v43 = vadd.f32 %v384_v29, %v319_v35 }
  0xb1   : > { %v441_v52 = vpack.c.bf16 %v385_v43, %v372_v42 }
  0xb3   : > { %v449_v59 = vrot.slane %v441_v52, 6  ;;  %v450_v63 = vrot.slane %v441_v52, 1 }
  0xb5   : > { %v373_v41 = vpop.f32.mrf.mxu2  ;;  %v462_v8 = vsel %vm459_vm9, %v449_v59, %v450_v63 }
  0xb6   : > { %v386_v44 = vpop.f32.mrf.mxu3  ;;  %v397_v45 = vpop.f32.mrf.mxu0  ;;  %v464_v16 = vsel %vm463_vm1, %v458_v12, %v462_v8 }
  0xb7   : > { %v398_v46 = vadd.f32 %v397_v45, %v320_v37  ;;  %v410_v47 = vpop.f32.mrf.mxu1 }
  0xb8   : > { %v411_v48 = vadd.f32 %v410_v47, %v321_v38 }
  0xba   : > { %v442_v55 = vpack.c.bf16 %v411_v48, %v398_v46 }
  0xbc   : > { %v451_v0 = vrot.slane %v442_v55, 4  ;;  %v452_v1 = vrot.slane %v442_v55, 7 }
  0xbd   : > { %v423_v58 = vpop.f32.mrf.mxu2 }
  0xbe   : > { %v424_v60 = vadd.f32 %v423_v58, %v322_v53  ;;  %v436_v61 = vpop.f32.mrf.mxu3  ;;  %v399_v62 = vpop.f32.mrf.mxu0  ;;  %v468_v9 = vsel %vm465_vm15, %v451_v0, %v452_v1 }
  0xbf   : > { %v437_v2 = vadd.f32 %v436_v61, %v323_v56  ;;  %v412_v3 = vpop.f32.mrf.mxu1 }
  0xc1   : > { %v443_v5 = vpack.c.bf16 %v437_v2, %v424_v60 }
  0xc3   : > { %v453_v10 = vrot.slane %v443_v5, 2  ;;  %v454_v11 = vrot.slane %v443_v5, 5 }
  0xc5   : > { %v472_v13 = vsel %vm469_vm8, %v453_v10, %v454_v11  ;;  %v425_v15 = vpop.f32.mrf.mxu2 }
  0xc6   : > { %v474_v17 = vsel %vm473_vm2, %v468_v9, %v472_v13  ;;  %v438_v18 = vpop.f32.mrf.mxu3 }
  0xc7   : > { %v476_v19 = vsel %vm475_vm5, %v464_v16, %v474_v17 }
  0xc8   : > { %v510_v20 = vsel %vm508_vm6, %v476_v19, %v509_v14 }
  0xc9   : > { %511 = vst [vmem:[%s261_s12] sm:$0xff] %v510_v20 }
  0xca PF: > { %s19_s17 = sadd.s32 1, %s866_s17   ;;  %s1095_s12 = smov %s850_s13 }
  0xcb   : > { %p16_p0 = scmp.ge.s32.totalorder %s19_s17, 4   ;;  %s1096_s13 = smov %s854_s14 }
  0xcc   : > { %s1097_s14 = smov %s939_s24  ;;  %s1098_s15 = smov %s862_s16 }
  0xcd   : > { %s1099_s16 = smov %s1101_s19  ;;  %18 = sbr.rel (!%p16_p0) target bundleno = 6 (0x6), region = 85 }
  0xd2   :  { %540 = vsyncpa [#allocation3], 1 }
  0xd3   :  { %542 = vsyncpa [#allocation3 + $0x1], 1 }
  0xd4   :  { %543 = vsyncpa [#allocation5], 1 }
  0xd5   :  { %545 = vsyncpa [#allocation5 + $0x1], 1 }

// kernel: semantic_forward.3
= control target key start
LH: loop header
LB: loop body
LE: loop exit
PB: predicated region body
PF: predicated region fallthrough
CT: control target
= control target key end

     0   :  { %s2355_s0 = inlined_call_operand.vmem [shape: f32[32,32], index: 0, kind: input, shape index: {}]   ;;  %s2356_s1 = inlined_call_operand.vmem [shape: bf16[2,32,32], index: 1, kind: input, shape index: {}]   ;;  %s2357_s2 = inlined_call_operand.vmem [shape: bf16[2,32,96], index: 2, kind: input, shape index: {}]   ;;  %s2358_s3 = inlined_call_operand.vmem [shape: bf16[2,32,32], index: 3, kind: input, shape index: {}]   ;;  %s2359_s4 = inlined_call_operand.vmem [shape: bf16[2,32,128], index: 4, kind: input, shape index: {}]   ;;  %s2360_s5 = inlined_call_operand.vmem [shape: bf16[2,128,32], index: 5, kind: input, shape index: {}]   ;;  %s2361_s6 = inlined_call_operand.vmem [shape: f32[2,1,96], index: 6, kind: input, shape index: {}]   ;;  %s2362_s7 = inlined_call_operand.vmem [shape: f32[2,1,128], index: 7, kind: input, shape index: {}]   ;;  %s2363_s8 = inlined_call_operand.vmem [shape: f32[2,8,32], index: 8, kind: input, shape index: {}]   ;;  %s2364_s9 = inlined_call_operand.hbm [shape: f32[32,32], index: 9, kind: output, shape index: {}]  }
   0x1   :  { %2377 = sst [smem:[#allocation15_spill]] %s2355_s0 }
   0x2   :  { %2378 = sst [smem:[#allocation16_spill]] %s2356_s1 }
   0x3   :  { %2379 = sst [smem:[#allocation17_spill]] %s2357_s2 }
   0x4   :  { %2380 = sst [smem:[#allocation18_spill]] %s2358_s3 }
   0x5   :  { %2381 = sst [smem:[#allocation19_spill]] %s2364_s9 }
   0x6   :  { %14 = vsyncpa [#allocation3], 0 }
   0x7   :  { %16 = vsyncpa [#allocation3 + $0x1], 0  ;;  %s2047_s30 = smov 0   ;;  %s2049_s10 = smov 0  }
   0x8   :  { %s2051_s11 = smov 0   ;;  %s2053_s12 = smov 0  }
   0x9   :  { %s2055_s13 = smov 0   ;;  %s2057_s14 = smov 0  }
   0xa   :  { %s2059_s15 = smov 0   ;;  %s2061_s16 = smov 0  }
   0xb LB: > { %2382 = sst [smem:[#allocation5_spill]] %s1955_s30  ;;  %s1586_s17 = sadd.s32 4294967295, %s1983_s16   ;;  %s1983_s16 = sphi %s2061_s16, %s22_s16   ;;  %s1979_s15 = sphi %s2059_s15, %s2410_s15   ;;  %s1975_s14 = sphi %s2057_s14, %s2409_s14   ;;  %s1971_s13 = sphi %s2055_s13, %s2408_s13   ;;  %s1967_s12 = sphi %s2053_s12, %s2407_s12   ;;  %s1963_s11 = sphi %s2051_s11, %s2406_s11   ;;  %s1959_s10 = sphi %s2049_s10, %s2412_s10   ;;  %s1955_s30 = sphi %s2047_s30, %s2411_s30  }
   0xc   : > { %2383 = sst [smem:[#allocation6_spill]] %s1963_s11  ;;  %s1587_s18 = sadd.s32 4294967294, %s1983_s16  }
   0xd   : > { %2384 = sst [smem:[#allocation7_spill]] %s1975_s14  ;;  %s31_s19 = sadd.s32 1, %s1975_s14 }
   0xe   : > { %2385 = sst [smem:[#allocation8_spill]] %s1979_s15  ;;  %p32_p0 = scmp.ge.s32.totalorder %s31_s19, 2 }
   0xf   : > { %2386 = sst [smem:[#allocation9_spill]] %s1983_s16  ;;  %s34_s20 = sadd.s32 1, %s1979_s15 }
  0x10   : > { %p285_p1 = scmp.ne.s32.totalorder %s1963_s11, %s1959_s10  ;;  %p286_p2 = scmp.eq.s32.totalorder %s1586_s17, 3 }
  0x11   : > { %s2414_s19 = smov (%p32_p0, %s31_s19), 0  ;;  %s2416_s20 = smov (!%p32_p0, %s34_s20), %s1979_s15 }
  0x12   : > { %2387 = sst [smem:[#allocation10_spill]] %s2414_s19  ;;  %p2096_p3 = por %p286_p2, %p285_p1 }
  0x13   : > { %p291_p4 = scmp.ne.s32.totalorder %s1959_s10, %s1955_s30  ;;  %p36_p5 = scmp.ge.s32.totalorder %s2416_s20, 2 }
  0x14   : > { %s2388_s21 = scalar_select %p2096_p3, 1, 0 }
  0x15   : > { %p292_p6 = scmp.eq.s32.totalorder %s1587_s18, 3  ;;  %p1590_p7 = scmp.ge.s32.totalorder %s1983_s16, 1 }
  0x16   : > { %2389 = sst [smem:[#allocation11_spill]] %s2388_s21  ;;  %p378_p8 = scmp.lt.s32.totalorder %s1983_s16, 5 }
  0x17   : > { %s2418_s20 = smov (%p36_p5, %s2416_s20), 0  ;;  %p2106_p9 = por %p292_p6, %p291_p4 }
  0x18   : > { %2390 = sst [smem:[#allocation12_spill]] %s2418_s20  ;;  %p379_p10 = pnand %p1590_p7, %p378_p8 }
  0x19   : > { %s2391_s22 = scalar_select %p2106_p9, 1, 0 }
  0x1a   : > { %s272_s23 = ssub.s32 %s1979_s15, %s2418_s20  ;;  %s275_s24 = sadd.s32 1, %s1963_s11 }
  0x1b   : > { %2392 = sst [smem:[#allocation13_spill]] %s2391_s22  ;;  %p273_p11 = scmp.eq.s32.totalorder %s272_s23, 0 }
  0x1c   : > { %382 = sbr.rel (%p379_p10) target bundleno = 2356 (0x934), region = 56  ;;  %s2367_s26 = sand.u32 (!%p379_p10), 1, %s1959_s10  }
  0x1d   : > { %s2114_s25 = scalar_select %p273_p11, %s1963_s11, %s275_s24  }
  0x1e   : > { %s1592_s27 = sshll.u32 (!%p379_p10), %s1971_s13, 1  ;;  %s1591_s28 = sshll.u32 (!%p379_p10), %s2367_s26, 4 }
  0x1f   : > { %2393 = sst [smem:[#allocation14_spill]] %s2114_s25  ;;  %p450_p12 = scmp.lt.s32.totalorder (!%p379_p10), %s1592_s27, 3 }
  0x20   : > { %p455_p13 = scmp.lt.s32.totalorder (!%p379_p10), %s1967_s12, 1  ;;  %s2394_s0 = sld [smem:[#allocation15_spill]] (!%p379_p10) }
  0x21   : > { %s2420_s27 = smov (!%p450_p12, %s1592_s27), 3  ;;  %s2395_s1 = sld [smem:[#allocation16_spill]] }
  0x22   : > { %s2122_s29 = scalar_select %p455_p13, %s1967_s12, 1 }
  0x23   : > { %s1593_s17 = sshll.u32 %s2420_s27, 3  ;;  %s2396_s2 = sld [smem:[#allocation17_spill]] }
  0x24   : > { %s1695_s20 = sshll.u32 %s2122_s29, 4  ;;  %s2397_s3 = sld [smem:[#allocation18_spill]] }
  0x25   : > { %s2142_s9 = scalar_lea.vmem %s2359_s4, %s1695_s20  ;;  %s482_s15 = scalar_lea.vmem %s2361_s6, %s2122_s29 }
  0x26   : > { %s453_s24 = scalar_lea.vmem %s2394_s0, %s1593_s17  ;;  %s1699_s17 = sshll.u32 %s2122_s29, 6 }
  0x27   : > { %s459_s26 = scalar_lea.vmem %s2395_s1, %s1695_s20  ;;  %s2152_s14 = scalar_lea.vmem %s2360_s5, %s1699_s17 }
  0x28   : > { %s485_s30 = scalar_lea.vmem %s2362_s7, %s2122_s29  ;;  %s1604_s22 = sshll.u32 %s2122_s29, 3 }
  0x29   : > { %s464_s11 = scalar_lea.vmem %s2396_s2, %s1695_s20  ;;  %s2162_s21 = scalar_lea.vmem [#allocation2], %s1591_s28 }
  0x2a   : > { %s2137_s16 = scalar_lea.vmem %s2397_s3, %s1695_s20  ;;  %s489_s20 = scalar_lea.vmem %s2363_s8, %s1604_s22 }
  0x2b   : > { %p1605_p0 = scmp.ne.s32.totalorder %s1967_s12, 0 }
  0x2d   : > { %495 = sbr.rel (%p1605_p0) target bundleno = 53 (0x35), region = 60 }
  0x32   : > { %v496_v0 = vld [vmem:[%s453_s24] sm:$0xff]  ;;  %vm498_vm0 = vcmask 261120   ;;  %v497_v1 = vld [vmem:[%s453_s24 + $0x8] sm:$0xff] }
  0x33   : > { %499 = vst.msk [vmem:[%s2162_s21] sm:$0xff] %vm498_vm0, %v496_v0 }
  0x34   : > { %500 = vst.msk [vmem:[%s2162_s21 + $0x8] sm:$0xff] %vm498_vm0, %v497_v1 }
  0x35 PF: > { %v1701_v2 = vld [vmem:[%s459_s26 + $0x8] sm:$0xff]  ;;  %v1700_v3 = vld [vmem:[%s459_s26] sm:$0xff]  ;;  %vm522_vm1 = vcmask 261120   ;;  %s1985_s2 = smov 112   ;;  %s1986_s3 = smov 96   ;;  %vm621_vm2 = vcmask 1043456  }
  0x36   : > { %532 = vmatpush.bf16.msra.mxu0 %v1701_v2  ;;  %v1703_v7 = vld [vmem:[%s464_s11 + $0x8] sm:$0xff]  ;;  %v1702_v8 = vld [vmem:[%s464_s11] sm:$0xff]  ;;  %s1987_s11 = smov 120   ;;  %s1988_s12 = smov 104   ;;  %vm617_vm3 = vcmask 64512   ;;  %vm852_vm4 = vcmask 130048  }
  0x37   : > { %570 = vmatpush.bf16.msra.mxu1 %v1703_v7  ;;  %v2170_v10 = vld [vmem:[%s489_s20] sm:$0xff]  ;;  %s1989_s26 = smov 64   ;;  %s1990_s28 = smov 40   ;;  %vm854_vm5 = vcmask 195584  }
  0x38   : > { %v509_v11 = vperm.slane %v2170_v10, 0  ;;  %v1843_v16 = vld [vmem:[%s482_s15] ss:$0 sm:$0xff]  ;;  %s1991_s24 = smov 56   ;;  %s1992_s27 = smov 48  }
  0x39   : > { %s1993_s17 = smov 8   ;;  %s1994_s18 = smov 16  }
  0x3a   : > { %v502_v4 = vld [vmem:[%s2162_s21] sm:$0xff]  ;;  %533 = vmatpush.bf16.msra.mxu0 %v1700_v3  ;;  %s1995_s23 = smov 24   ;;  %s1716_s29 = sshll.u32 %s1971_s13, 4 }
  0x3b   : > { %v503_v5 = vld [vmem:[%s2162_s21 + $0x8] sm:$0xff]  ;;  %571 = vmatpush.bf16.msra.mxu1 %v1702_v8  ;;  %s1420_s20 = sshll.u32 %s2162_s21, 4  ;;  %s2401_s13 = sand.u32 1, %s1959_s10   ;;  %s1421_s20 = int_to_ptr.vmem [resolvable:$true] %s1420_s20 }
  0x3c   : > { %v508_v6 = vpack.c.bf16 %v503_v5, %v502_v4  ;;  %s1408_s1 = scalar_lea.sflag [#allocation3], %s2401_s13 }
  0x3e   : > { %1614 = vmatmul.msk.bf16.vlgmr.msra.gmra.mxu0 %vm522_vm1, %v508_v6 }
  0xbb   : > { %v535_v9 = vpop.f32.mrf.mxu0 }
  0xbc   : > { %v2173_v13 = vadd.f32 %v535_v9, %v509_v11 }
  0xc3   : > { %v537_v12 = vpop.f32.mrf.mxu0 }
  0xc4   : > { %v2175_v14 = vadd.f32 %v537_v12, %v509_v11 }
  0xc6   : > { %v544_v15 = vpack.c.bf16 %v2175_v14, %v2173_v13 }
  0xc8   : > { %1623 = vmatmul.msk.bf16.vlgmr.msra.gmra.mxu1 %vm522_vm1, %v544_v15 }
 0x145   : > { %v573_v17 = vpop.f32.mrf.mxu1 }
 0x146   : > { %v574_v18 = vadd.f32 %v1843_v16, %v573_v17 }
 0x148   : > { %v578_v19 = vmul.f32 0.35355338, %v574_v18  ;;  %v2185_v26 = vpack.c.bf16 %v574_v18, %v574_v18 }
 0x14a   : > { %v615_v20 = vpack.c.bf16 %v578_v19, %v578_v19 }
 0x14c   : > { %730 = vrot.lane.b32.xlu2 %v615_v20, %s1985_s2 }
 0x14d   : > { %v575_v21 = vpop.f32.mrf.mxu1 }
 0x14e   : > { %v576_v22 = vadd.f32 %v1843_v16, %v575_v21 }
 0x150   : > { %v856_v23 = vmul.f32 0.35355338, %v576_v22  ;;  %v1801_v24 = vpack.i.bf16 %v576_v22, %v574_v18  ;;  %v2188_v28 = vpack.c.bf16 %v576_v22, %v576_v22 }
 0x152   : > { %v893_v25 = vpack.c.bf16 %v856_v23, %v856_v23  ;;  %1802 = vrot.lane.b32.xlu0 %v1801_v24, %s1986_s3 }
 0x154   : > { %951 = vrot.lane.b32.xlu2 %v893_v25, %s1987_s11 }
 0x15a   : > { %675 = vrot.lane.b32.xlu0 %v615_v20, %s1987_s11 }
 0x15c   : > { %1006 = vrot.lane.b32.xlu2 %v893_v25, %s1985_s2 }
 0x162   : > { %1061 = vrot.lane.b32.xlu0 %v893_v25, %s1988_s12 }
 0x16a   : > { %652 = vrot.lane.b32.xlu0 %v2185_v26, %s1989_s26 }
 0x1a6   : > { %v731_v52 = vpop.permute.xlu2 %730 }
 0x1ae   : > { %v952_v59 = vpop.permute.xlu2 %951 }
 0x1b6   : > { %v1007_v61 = vpop.permute.xlu2 %1006 }
 0x1c4   : > { %v1803_v27 = vpop.permute.xlu0 %1802 }
 0x1c5   : > { %1807 = vxpose.xlu1.b32.start.end [1/1] (short) (narrow) %v1803_v27, 32 }
 0x1cc   : > { %v676_v29 = vpop.permute.xlu0 %675 }
 0x1d4   : > { %v1062_v30 = vpop.permute.xlu0 %1061 }
 0x1dc   : > { %v653_v33 = vpop.permute.xlu0 %652 }
 0x1dd   : > { %v658_v36 = vsel %vm621_vm2, %v653_v33, 0 }
 0x237   : > { %785 = vrot.lane.b32.xlu1 %v615_v20, %s1988_s12 }
 0x23f   : > { %928 = vrot.lane.b32.xlu1 %v2188_v28, %s1989_s26 }
 0x269   : > { %v1808_v31 = vpop.trf.xlu1 }
 0x26a   : > { %v1809_v32 = vunpack.i.l.bf16 %v1808_v31  ;;  %v1812_v41 = vunpack.i.h.bf16 %v1808_v31 }
 0x26c   : > { %v616_v34 = vpack.c.bf16 %v1809_v32, %v1809_v32  ;;  %v894_v45 = vpack.c.bf16 %v1812_v41, %v1812_v41 }
 0x26e   : > { %v623_v35 = vsel %vm621_vm2, %v616_v34, 0  ;;  %v899_v50 = vsel %vm621_vm2, %v894_v45, 0 }
 0x26f   : > { %632 = vmatpush.bf16.msra.mxu3 %v623_v35 }
 0x271   : > { %v1813_v37 = vpop.trf.xlu1 }
 0x272   : > { %1624 = vmatmul.msk.bf16.vlgmr.msra.gmra.mxu3 %vm617_vm3, %v615_v20  ;;  %v1814_v38 = vunpack.i.l.bf16 %v1813_v37  ;;  %v1817_v49 = vunpack.i.h.bf16 %v1813_v37 }
 0x273   : > { %667 = vmatpush.bf16.msrb.mxu3 %v658_v36 }
 0x274   : > { %v673_v39 = vpack.c.bf16 %v1814_v38, %v1814_v38  ;;  %v949_v55 = vpack.c.bf16 %v1817_v49, %v1817_v49 }
 0x276   : > { %v681_v40 = vsel %vm621_vm2, %v673_v39, 0  ;;  %v957_v58 = vsel %vm621_vm2, %v949_v55, 0 }
 0x277   : > { %690 = vmatpush.bf16.msra.mxu2 %v681_v40 }
 0x279   : > { %v1818_v42 = vpop.trf.xlu1 }
 0x27a   : > { %v1822_v43 = vunpack.i.h.bf16 %v1818_v42  ;;  %1626 = vmatmul.msk.bf16.vlgmr.msra.gmra.mxu2 %vm617_vm3, %v676_v29  ;;  %v1819_v44 = vunpack.i.l.bf16 %v1818_v42 }
 0x27c   : > { %v729_v46 = vpack.c.bf16 %v1819_v44, %v1819_v44  ;;  %v1005_v47 = vpack.c.bf16 %v1822_v43, %v1822_v43 }
 0x27e   : > { %v736_v48 = vsel %vm621_vm2, %v729_v46, 0  ;;  %v1012_v51 = vsel %vm621_vm2, %v1005_v47, 0 }
 0x27f   : > { %745 = vmatpush.bf16.msrb.mxu0 %v736_v48 }
 0x281   : > { %v1823_v53 = vpop.trf.xlu1 }
 0x282   : > { %1628 = vmatmul.msk.bf16.vlgmr.msrb.gmra.mxu0 %vm617_vm3, %v731_v52  ;;  %v1824_v54 = vunpack.i.l.bf16 %v1823_v53  ;;  %v1827_v60 = vunpack.i.h.bf16 %v1823_v53 }
 0x283   : > { %908 = vmatpush.bf16.msra.mxu0 %v899_v50 }
 0x284   : > { %v784_v56 = vpack.c.bf16 %v1824_v54, %v1824_v54  ;;  %v1060_v62 = vpack.c.bf16 %v1827_v60, %v1827_v60 }
 0x286   : > { %v791_v57 = vsel %vm621_vm2, %v784_v56, 0  ;;  %v1067_v63 = vsel %vm621_vm2, %v1060_v62, 0 }
 0x287   : > { %1021 = vmatpush.bf16.msrb.mxu0 %v1012_v51  ;;  %800 = vmatpush.bf16.msrb.mxu2 %v791_v57 }
 0x28b   : > { %966 = vmatpush.bf16.msra.mxu2 %v957_v58 }
 0x292   : > { %1632 = vmatmul.msk.bf16.vlgmr.msra.gmra.mxu0 %vm617_vm3, %v893_v25 }
 0x2a2   : > { %1636 = vmatmul.msk.bf16.vlgmr.msrb.gmra.mxu0 %vm617_vm3, %v1007_v61 }
 0x2a9   : > { %v786_v0 = vpop.permute.xlu1 %785 }
 0x2aa   : > { %1630 = vmatmul.msk.bf16.vlgmr.msrb.gmra.mxu2 %vm617_vm3, %v786_v0 }
 0x2ab   : > { %1076 = vmatpush.bf16.msrb.mxu2 %v1067_v63 }
 0x2ba   : > { %1634 = vmatmul.msk.bf16.vlgmr.msra.gmra.mxu2 %vm617_vm3, %v952_v59 }
 0x2ca   : > { %1638 = vmatmul.msk.bf16.vlgmr.msrb.gmra.mxu2 %vm617_vm3, %v1062_v30 }
 0x2f5   : > { %v634_v1 = vpop.f32.mrf.mxu3 }
 0x2f6   : > { %v638_v2 = vsel %vm617_vm3, %v634_v1, -inf }
 0x2f7   : > { %639 = vmax.xlane.f32.xlu0 %v638_v2 }
 0x2fd   : > { %v636_v3 = vpop.f32.mrf.mxu3  ;;  %v692_v4 = vpop.f32.mrf.mxu2 }
 0x2fe   : > { %v696_v5 = vsel %vm617_vm3, %v692_v4, -inf }
 0x2ff   : > { %v747_v6 = vpop.f32.mrf.mxu0  ;;  %697 = vmax.xlane.f32.xlu2 %v696_v5 }
 0x300   : > { %v751_v17 = vsel %vm617_vm3, %v747_v6, -inf }
 0x305   : > { %v694_v7 = vpop.f32.mrf.mxu2 }
 0x307   : > { %v749_v8 = vpop.f32.mrf.mxu0 }
 0x30b   : > { %818 = vrot.lane.b32.xlu0 %v2185_v26, %s1990_s28 }
 0x30f   : > { %v2212_v9 = vpop.f32.mrf.mxu0 }
 0x310   : > { %v914_v23 = vsel %vm617_vm3, %v2212_v9, -inf }
 0x317   : > { %v912_v11 = vpop.f32.mrf.mxu0  ;;  %708 = vrot.lane.b32.xlu2 %v2185_v26, %s1991_s24 }
 0x31f   : > { %v1023_v12 = vpop.f32.mrf.mxu0 }
 0x320   : > { %v1027_v19 = vsel %vm617_vm3, %v1023_v12, -inf }
 0x327   : > { %v1025_v15 = vpop.f32.mrf.mxu0 }
 0x32d   : > { %v802_v16 = vpop.f32.mrf.mxu2 }
 0x32e   : > { %v806_v21 = vsel %vm617_vm3, %v802_v16, -inf }
 0x335   : > { %v804_v18 = vpop.f32.mrf.mxu2  ;;  %752 = vmax.xlane.f32.xlu0 %v751_v17  ;;  %v929_v17 = vpop.permute.xlu1 %928 }
 0x33d   : > { %v968_v20 = vpop.f32.mrf.mxu2  ;;  %1028 = vmax.xlane.f32.xlu0 %v1027_v19 }
 0x33e   : > { %v972_v25 = vsel %vm617_vm3, %v968_v20, -inf }
 0x340   : > { %807 = vmax.xlane.f32.xlu2 %v806_v21  ;;  %v934_v21 = vsel %vm621_vm2, %v929_v17, 0 }
 0x345   : > { %v970_v22 = vpop.f32.mrf.mxu2 }
 0x348   : > { %915 = vmax.xlane.f32.xlu2 %v914_v23 }
 0x34d   : > { %v1078_v24 = vpop.f32.mrf.mxu2 }
 0x34e   : > { %v1082_v29 = vsel %vm617_vm3, %v1078_v24, -inf }
 0x350   : > { %973 = vmax.xlane.f32.xlu2 %v972_v25 }
 0x355   : > { %v1080_v27 = vpop.f32.mrf.mxu2 }
 0x358   : > { %1083 = vmax.xlane.f32.xlu2 %v1082_v29 }
 0x36a   : > { %v640_v30 = vpop.xlane.xlu0 %639 }
 0x36b   : > { %v641_v31 = vsub.f32 %v634_v1, %v640_v30 }
 0x36d   : > { %v642_v32 = vmul.f32 1.442695, %v641_v31 }
 0x36f   : > { %1845 = vpow2.f32 %v642_v32 }
 0x372   : > { %v698_v33 = vpop.xlane.xlu2 %697 }
 0x373   : > { %v699_v34 = vsub.f32 %v692_v4, %v698_v33 }
 0x375   : > { %v1846_v35 = vpop.eup %1845  ;;  %v700_v36 = vmul.f32 1.442695, %v699_v34 }
 0x376   : > { %v644_v37 = vsel %vm617_vm3, %v1846_v35, 0.0 }
 0x377   : > { %1847 = vpow2.f32 %v700_v36  ;;  %645 = vadd.xlane.f32.xlu0 %v644_v37 }
 0x37a   : > { %v709_v38 = vpop.permute.xlu2 %708 }
 0x37b   : > { %v714_v39 = vsel %vm621_vm2, %v709_v38, 0 }
 0x37c   : > { %723 = vmatpush.bf16.msra.mxu3 %v714_v39 }
 0x37d   : > { %v2225_v40 = vpop.eup %1847  ;;  %v819_v42 = vpop.permute.xlu0 %818 }
 0x37e   : > { %v702_v41 = vsel %vm617_vm3, %v2225_v40, 0.0 }
 0x37f   : > { %703 = vadd.xlane.f32.xlu2 %v702_v41 }
 0x38b   : > { %763 = vrot.lane.b32.xlu0 %v2185_v26, %s1992_s27 }
 0x393   : > { %984 = vrot.lane.b32.xlu0 %v2188_v28, %s1991_s24 }
 0x3a8   : > { %v753_v43 = vpop.xlane.xlu0 %752 }
 0x3a9   : > { %v754_v44 = vsub.f32 %v747_v6, %v753_v43 }
 0x3ab   : > { %v755_v45 = vmul.f32 1.442695, %v754_v44 }
 0x3ad   : > { %1849 = vpow2.f32 %v755_v45 }
 0x3b0   : > { %v1029_v46 = vpop.xlane.xlu0 %1028 }
 0x3b1   : > { %v1030_v47 = vsub.f32 %v1023_v12, %v1029_v46 }
 0x3b3   : > { %v2233_v48 = vpop.eup %1849  ;;  %v1031_v49 = vmul.f32 1.442695, %v1030_v47  ;;  %v808_v50 = vpop.xlane.xlu2 %807 }
 0x3b4   : > { %v809_v51 = vsub.f32 %v802_v16, %v808_v50  ;;  %v757_v52 = vsel %vm617_vm3, %v2233_v48, 0.0  ;;  %v824_v16 = vsel %vm621_vm2, %v819_v42, 0 }
 0x3b5   : > { %1851 = vpow2.f32 %v1031_v49  ;;  %758 = vadd.xlane.f32.xlu2 %v757_v52 }
 0x3b6   : > { %v810_v26 = vmul.f32 1.442695, %v809_v51 }
 0x3b8   : > { %1853 = vpow2.f32 %v810_v26 }
 0x3bb   : > { %v2237_v53 = vpop.eup %1851  ;;  %v916_v54 = vpop.xlane.xlu2 %915 }
 0x3bc   : > { %v917_v55 = vsub.f32 %v2212_v9, %v916_v54  ;;  %v1033_v56 = vsel %vm617_vm3, %v2237_v53, 0.0 }
 0x3bd   : > { %1034 = vadd.xlane.f32.xlu0 %v1033_v56 }
 0x3be   : > { %v1854_v57 = vpop.eup %1853  ;;  %v918_v58 = vmul.f32 1.442695, %v917_v55 }
 0x3bf   : > { %v812_v59 = vsel %vm617_vm3, %v1854_v57, 0.0 }
 0x3c0   : > { %1855 = vpow2.f32 %v918_v58  ;;  %813 = vadd.xlane.f32.xlu1 %v812_v59 }
 0x3c3   : > { %v974_v60 = vpop.xlane.xlu2 %973 }
 0x3c4   : > { %v975_v61 = vsub.f32 %v968_v20, %v974_v60 }
 0x3c6   : > { %v1856_v62 = vpop.eup %1855  ;;  %v976_v63 = vmul.f32 1.442695, %v975_v61 }
 0x3c7   : > { %v920_v0 = vsel %vm617_vm3, %v1856_v62, 0.0 }
 0x3c8   : > { %1857 = vpow2.f32 %v976_v63  ;;  %921 = vadd.xlane.f32.xlu2 %v920_v0 }
 0x3cb   : > { %v1084_v1 = vpop.xlane.xlu2 %1083 }
 0x3cc   : > { %v1085_v2 = vsub.f32 %v1078_v24, %v1084_v1 }
 0x3ce   : > { %v1858_v3 = vpop.eup %1857  ;;  %v1086_v4 = vmul.f32 1.442695, %v1085_v2 }
 0x3cf   : > { %v978_v5 = vsel %vm617_vm3, %v1858_v3, 0.0 }
 0x3d0   : > { %1859 = vpow2.f32 %v1086_v4  ;;  %979 = vadd.xlane.f32.xlu1 %v978_v5 }
 0x3d6   : > { %v1860_v6 = vpop.eup %1859 }
 0x3d7   : > { %v1088_v7 = vsel %vm617_vm3, %v1860_v6, 0.0 }
 0x3d8   : > { %1089 = vadd.xlane.f32.xlu2 %v1088_v7 }
 0x3e9   : > { %1039 = vrot.lane.b32.xlu1 %v2188_v28, %s1992_s27 }
 0x3ea   : > { %v646_v8 = vpop.xlane.xlu0 %645 }
 0x3eb   : > { %1861 = vrcp.f32 %v646_v8 }
 0x3f0   : > { %1094 = vrot.lane.b32.xlu2 %v2188_v28, %s1990_s28 }
 0x3f1   : > { %v1862_v9 = vpop.eup %1861 }
 0x3f2   : > { %v648_v11 = vmul.f32 %v1862_v9, %v1846_v35  ;;  %v704_v12 = vpop.xlane.xlu2 %703  ;;  %v1705_v9 = vld [vmem:[%s2137_s16 + $0x8] sm:$0xff] }
 0x3f3   : > { %1863 = vrcp.f32 %v704_v12  ;;  %1157 = vmatpush.bf16.msra.mxu0 %v1705_v9 }
 0x3f4   : > { %v649_v15 = vpack.c.bf16 %v648_v11, %v648_v11  ;;  %v1704_v11 = vld [vmem:[%s2137_s16] sm:$0xff] }
 0x3f6   : > { %1625 = vmatmul.msk.bf16.vlgmr.msrb.gmra.mxu3 %vm617_vm3, %v649_v15 }
 0x3f7   : > { %833 = vmatpush.bf16.msrb.mxu3 %v824_v16  ;;  %1158 = vmatpush.bf16.msra.mxu0 %v1704_v11 }
 0x3f9   : > { %v1864_v18 = vpop.eup %1863 }
 0x3fa   : > { %v706_v28 = vmul.f32 %v1864_v18, %v2225_v40 }
 0x3fc   : > { %v707_v22 = vpack.c.bf16 %v706_v28, %v706_v28 }
 0x3fd   : > { %v764_v19 = vpop.permute.xlu0 %763 }
 0x3fe   : > { %v769_v20 = vsel %vm621_vm2, %v764_v19, 0 }
 0x3ff   : > { %778 = vmatpush.bf16.msrb.mxu1 %v769_v20 }
 0x403   : > { %943 = vmatpush.bf16.msra.mxu1 %v934_v21 }
 0x405   : > { %v985_v23 = vpop.permute.xlu0 %984 }
 0x406   : > { %v990_v24 = vsel %vm621_vm2, %v985_v23, 0  ;;  %1627 = vmatmul.msk.bf16.vlgmr.msra.gmra.mxu3 %vm617_vm3, %v707_v22 }
 0x407   : > { %999 = vmatpush.bf16.msra.mxu3 %v990_v24 }
 0x428   : > { %v759_v25 = vpop.xlane.xlu2 %758 }
 0x429   : > { %1865 = vrcp.f32 %v759_v25 }
 0x42f   : > { %v1866_v27 = vpop.eup %1865 }
 0x430   : > { %v761_v29 = vmul.f32 %v1866_v27, %v2233_v48  ;;  %v1035_v44 = vpop.xlane.xlu0 %1034 }
 0x432   : > { %v762_v30 = vpack.c.bf16 %v761_v29, %v761_v29 }
 0x433   : > { %v814_v31 = vpop.xlane.xlu1 %813 }
 0x434   : > { %1867 = vrcp.f32 %v814_v31  ;;  %1629 = vmatmul.msk.bf16.vlgmr.msrb.gmra.mxu1 %vm617_vm3, %v762_v30  ;;  %v1135_v31 = vperm.slane %v2170_v10, 1 }
 0x43a   : > { %v1868_v32 = vpop.eup %1867 }
 0x43b   : > { %v816_v33 = vmul.f32 %v1868_v32, %v1854_v57  ;;  %v922_v34 = vpop.xlane.xlu2 %921 }
 0x43c   : > { %1869 = vrcp.f32 %v922_v34 }
 0x43d   : > { %v817_v35 = vpack.c.bf16 %v816_v33, %v816_v33 }
 0x43f   : > { %1631 = vmatmul.msk.bf16.vlgmr.msrb.gmra.mxu3 %vm617_vm3, %v817_v35 }
 0x442   : > { %v1870_v36 = vpop.eup %1869 }
 0x443   : > { %v924_v37 = vmul.f32 %v1870_v36, %v1856_v62  ;;  %v980_v38 = vpop.xlane.xlu1 %979 }
 0x444   : > { %1871 = vrcp.f32 %v980_v38 }
 0x445   : > { %v925_v39 = vpack.c.bf16 %v924_v37, %v924_v37 }
 0x447   : > { %1633 = vmatmul.msk.bf16.vlgmr.msra.gmra.mxu1 %vm617_vm3, %v925_v39 }
 0x44a   : > { %v1872_v40 = vpop.eup %1871 }
 0x44b   : > { %v982_v41 = vmul.f32 %v1872_v40, %v1858_v3  ;;  %v1090_v42 = vpop.xlane.xlu2 %1089 }
 0x44c   : > { %1873 = vrcp.f32 %v1090_v42 }
 0x44d   : > { %v983_v43 = vpack.c.bf16 %v982_v41, %v982_v41  ;;  %1875 = vrcp.f32 %v1035_v44 }
 0x44f   : > { %1635 = vmatmul.msk.bf16.vlgmr.msra.gmra.mxu3 %vm617_vm3, %v983_v43 }
 0x452   : > { %v1874_v47 = vpop.eup %1873 }
 0x453   : > { %v1095_v45 = vpop.permute.xlu2 %1094  ;;  %v1876_v48 = vpop.eup %1875  ;;  %v1092_v49 = vmul.f32 %v1874_v47, %v1860_v6 }
 0x454   : > { %v1100_v46 = vsel %vm621_vm2, %v1095_v45, 0  ;;  %v1037_v50 = vmul.f32 %v1876_v48, %v2237_v53 }
 0x455   : > { %1109 = vmatpush.bf16.msrb.mxu3 %v1100_v46  ;;  %v1093_v26 = vpack.c.bf16 %v1092_v49, %v1092_v49  ;;  %v1707_v49 = vld [vmem:[%s2142_s9 + $0x8] sm:$0xff] }
 0x456   : > { %v1038_v54 = vpack.c.bf16 %v1037_v50, %v1037_v50 }
 0x45b   : > { %v1040_v51 = vpop.permute.xlu1 %1039 }
 0x45c   : > { %v1045_v52 = vsel %vm621_vm2, %v1040_v51, 0 }
 0x45d   : > { %1054 = vmatpush.bf16.msrb.mxu1 %v1045_v52  ;;  %v1706_v52 = vld [vmem:[%s2142_s9] sm:$0xff] }
 0x45f   : > { %1639 = vmatmul.msk.bf16.vlgmr.msrb.gmra.mxu3 %vm617_vm3, %v1093_v26 }
 0x460   : > { %1637 = vmatmul.msk.bf16.vlgmr.msrb.gmra.mxu1 %vm617_vm3, %v1038_v54 }
 0x461   : > { %1247 = vmatpush.bf16.msra.mxu1 %v1707_v49  ;;  %v1290_v49 = vperm.slane %v2170_v10, 2 }
 0x465   : > { %1248 = vmatpush.bf16.msra.mxu1 %v1706_v52 }
 0x479   : > { %v669_v55 = vpop.f32.mrf.mxu3 }
 0x481   : > { %v671_v56 = vpop.f32.mrf.mxu3 }
 0x489   : > { %v725_v57 = vpop.f32.mrf.mxu3 }
 0x491   : > { %v727_v58 = vpop.f32.mrf.mxu3 }
 0x4b1   : > { %v780_v59 = vpop.f32.mrf.mxu1 }
 0x4b9   : > { %v782_v60 = vpop.f32.mrf.mxu1 }
 0x4c2   : > { %v835_v61 = vpop.f32.mrf.mxu3 }
 0x4c4   : > { %v945_v62 = vpop.f32.mrf.mxu1 }
 0x4ca   : > { %v837_v63 = vpop.f32.mrf.mxu3 }
 0x4cc   : > { %v947_v53 = vpop.f32.mrf.mxu1 }
 0x4d2   : > { %v1001_v0 = vpop.f32.mrf.mxu3 }
 0x4d3   : > { %v1833_v1 = vpack.i.bf16 %v1001_v0, %v725_v57 }
 0x4d5   : > { %1834 = vrot.lane.b32.xlu1 %v1833_v1, %s1993_s17 }
 0x4da   : > { %v1003_v2 = vpop.f32.mrf.mxu3 }
 0x4dd   : > { %v1056_v3 = vpop.f32.mrf.mxu1 }
 0x4de   : > { %v1828_v4 = vpack.i.bf16 %v1056_v3, %v780_v59  ;;  %v1211_v3 = vperm.slane %v2170_v10, 3 }
 0x4e0   : > { %1829 = vrot.lane.b32.xlu2 %v1828_v4, %s1994_s18 }
 0x4e2   : > { %v1111_v5 = vpop.f32.mrf.mxu3 }
 0x4e3   : > { %v1838_v6 = vpack.i.bf16 %v1111_v5, %v835_v61 }
 0x4e5   : > { %v1058_v7 = vpop.f32.mrf.mxu1  ;;  %1839 = vrot.lane.b32.xlu1 %v1838_v6, %s1995_s23 }
 0x4e6   : > { %v1214_v7 = vperm.slane %v2170_v10, 4 }
 0x4ea   : > { %v1113_v8 = vpop.f32.mrf.mxu3 }
 0x53a   : > { %v1830_v17 = vpop.permute.xlu2 %1829 }
 0x53b   : > { %v1832_v20 = vunpack.i.h.bf16 %v1830_v17  ;;  %v1831_v21 = vunpack.i.l.bf16 %v1830_v17  ;;  %v1715_v17 = vld [vmem:[%s2152_s14 + $0x38] sm:$0xff] }
 0x53c   : > { %1339 = vmatpush.bf16.msra.mxu2 %v1715_v17 }
 0x547   : > { %v1835_v12 = vpop.permute.xlu1 %1834 }
 0x548   : > { %v1837_v15 = vunpack.i.h.bf16 %v1835_v12  ;;  %v1836_v16 = vunpack.i.l.bf16 %v1835_v12 }
 0x54a   : > { %v1127_v18 = vsel %vm617_vm3, %v945_v62, %v1837_v15  ;;  %v851_v19 = vsel %vm617_vm3, %v669_v55, %v1836_v16 }
 0x54b   : > { %v853_v24 = vsel %vm852_vm4, %v851_v19, %v1831_v21  ;;  %v1128_v25 = vsel %vm852_vm4, %v1127_v18, %v1832_v20  ;;  %v1714_v18 = vld [vmem:[%s2152_s14 + $0x30] sm:$0xff]  ;;  %v1713_v19 = vld [vmem:[%s2152_s14 + $0x28] sm:$0xff]  ;;  %v1712_v20 = vld [vmem:[%s2152_s14 + $0x20] sm:$0xff] }
 0x54c   : > { %1340 = vmatpush.bf16.msra.mxu2 %v1714_v18  ;;  %v1711_v21 = vld [vmem:[%s2152_s14 + $0x18] sm:$0xff] }
 0x550   : > { %1341 = vmatpush.bf16.msra.mxu2 %v1713_v19  ;;  %v1399_v19 = vperm.slane %v2170_v10, 5 }
 0x554   : > { %1342 = vmatpush.bf16.msra.mxu2 %v1712_v20 }
 0x557   : > { %v1840_v28 = vpop.permute.xlu1 %1839 }
 0x558   : > { %v1842_v22 = vunpack.i.h.bf16 %v1840_v28  ;;  %v1841_v23 = vunpack.i.l.bf16 %v1840_v28  ;;  %1343 = vmatpush.bf16.msra.mxu2 %v1711_v21  ;;  %v1710_v28 = vld [vmem:[%s2152_s14 + $0x10] sm:$0xff] }
 0x55a   : > { %v1129_v27 = vsel %vm854_vm5, %v1128_v25, %v1842_v22  ;;  %v855_v29 = vsel %vm854_vm5, %v853_v24, %v1841_v23  ;;  %v1709_v22 = vld [vmem:[%s2152_s14 + $0x8] sm:$0xff]  ;;  %v1708_v23 = vld [vmem:[%s2152_s14] sm:$0xff]  ;;  %s2398_s14 = sld [smem:[#allocation19_spill]] }
 0x55b   : > { %v1134_v30 = vpack.c.bf16 %v1129_v27, %v855_v29  ;;  %v1844_v24 = vld [vmem:[%s485_s30] ss:$0 sm:$0xff] }
 0x55c   : > { %1344 = vmatpush.bf16.msra.mxu2 %v1710_v28  ;;  %v1402_v28 = vperm.slane %v2170_v10, 6 }
 0x55d   : > { %1648 = vmatmul.msk.bf16.vlgmr.msra.gmra.mxu0 %vm522_vm1, %v1134_v30 }
 0x560   : > { %1345 = vmatpush.bf16.msra.mxu2 %v1709_v22  ;;  %s2399_s25 = smov %s2398_s14  ;;  %s1419_s22 = scalar_lea.hbm %s2398_s14, %s1716_s29 }
 0x561   : > { %s1422_s0 = sshll.u32 %s1419_s22, 4  ;;  %s1909_s26 = scalar_lea.hbm %s2399_s25, 32  ;;  %s1423_s0 = int_to_ptr.hbm [resolvable:$true] %s1422_s0 }
 0x562   : > { %s1903_s2 = sshra.s32 %s1423_s0, 4  ;;  %s1904_s2 = int_to_ptr.hbm [resolvable:$true] %s1903_s2 }
 0x563   : > { %s1905_s3 = scalar_lea.hbm %s1904_s2, 16  ;;  %p1910_p5 = scmp.lt.s32.totalorder %s1904_s2, %s2399_s25 }
 0x564   : > { %1346 = vmatpush.bf16.msra.mxu2 %v1708_v23  ;;  %p1906_p1 = scmp.ne.s32.totalorder %s1904_s2, %s1905_s3  ;;  %p1911_p6 = scmp.lt.s32.totalorder %s1909_s26, %s1905_s3 }
 0x566   : > { %p1907_p2 = pnand %p1906_p1, %p2096_p3  ;;  %p1912_p7 = por %p1911_p6, %p1910_p5 }
 0x568   : > { %p1908_p4 = pneg %p1907_p2 }
 0x56a   : > { %p1913_p8 = pnand %p1912_p7, %p1908_p4 }
 0x5da   : > { %v1160_v32 = vpop.f32.mrf.mxu0 }
 0x5db   : > { %v1161_v33 = vadd.f32 %v1160_v32, %v1135_v31 }
 0x5dd   : > { %v1165_v34 = vadd.f32 %v1161_v33, %v2173_v13 }
 0x5df   : > { %v1167_v35 = vsel %vm522_vm1, %v1165_v34, 0.0 }
 0x5e0   : > { %1168 = vadd.xlane.f32.xlu2 %v1167_v35 }
 0x5e2   : > { %v1162_v36 = vpop.f32.mrf.mxu0 }
 0x5e3   : > { %v1163_v37 = vadd.f32 %v1162_v36, %v1135_v31 }
 0x5e5   : > { %v1166_v38 = vadd.f32 %v1163_v37, %v2175_v14 }
 0x5e7   : > { %v1170_v39 = vsel %vm522_vm1, %v1166_v38, 0.0 }
 0x5e8   : > { %1171 = vadd.xlane.f32.xlu1 %v1170_v39 }
 0x653   : > { %v1169_v40 = vpop.xlane.xlu2 %1168 }
 0x654   : > { %v1173_v41 = vmul.f32 0.03125, %v1169_v40 }
 0x656   : > { %v1175_v42 = vsub.f32 %v1165_v34, %v1173_v41 }
 0x658   : > { %v1177_v43 = vmul.f32 %v1175_v42, %v1175_v42 }
 0x65a   : > { %v1179_v44 = vsel %vm522_vm1, %v1177_v43, 0.0 }
 0x65b   : > { %v1172_v45 = vpop.xlane.xlu1 %1171  ;;  %1180 = vadd.xlane.f32.xlu0 %v1179_v44 }
 0x65c   : > { %v1174_v13 = vmul.f32 0.03125, %v1172_v45 }
 0x65e   : > { %v1176_v46 = vsub.f32 %v1166_v38, %v1174_v13 }
 0x660   : > { %v1178_v47 = vmul.f32 %v1176_v46, %v1176_v46 }
 0x662   : > { %v1182_v48 = vsel %vm522_vm1, %v1178_v47, 0.0 }
 0x663   : > { %1183 = vadd.xlane.f32.xlu0 %v1182_v48 }
 0x6ce   : > { %v1181_v14 = vpop.xlane.xlu0 %1180 }
 0x6cf   : > { %v1185_v50 = vmul.f32 0.03125, %v1181_v14 }
 0x6d1   : > { %v1187_v51 = vadd.f32 1e-05, %v1185_v50 }
 0x6d3   : > { %1877 = vrsqrt.f32 %v1187_v51  ;;  %vm1195_vm7 = vweird.f32 %v1187_v51 }
 0x6d6   : > { %v1184_v26 = vpop.xlane.xlu0 %1183 }
 0x6d7   : > { %v1186_v54 = vmul.f32 0.03125, %v1184_v26 }
 0x6d9   : > { %v1878_v55 = vpop.eup %1877  ;;  %v1188_v56 = vadd.f32 1e-05, %v1186_v54 }
 0x6da   : > { %v1190_v57 = vmul.f32 %v1878_v55, %v1187_v51  ;;  %vm1196_vm6 = vweird.f32 %v1878_v55 }
 0x6db   : > { %1879 = vrsqrt.f32 %v1188_v56  ;;  %vm1197_vm8 = vmor %vm1195_vm7, %vm1196_vm6  ;;  %vm1205_vm10 = vweird.f32 %v1188_v56 }
 0x6dc   : > { %v1191_v58 = vmul.f32 %v1878_v55, %v1190_v57 }
 0x6de   : > { %v1192_v59 = vmul.f32 0.5, %v1191_v58 }
 0x6e0   : > { %v1193_v60 = vsub.f32 1.5, %v1192_v59 }
 0x6e1   : > { %v1880_v61 = vpop.eup %1879 }
 0x6e2   : > { %v1194_v62 = vmul.f32 %v1878_v55, %v1193_v60  ;;  %v1200_v63 = vmul.f32 %v1880_v61, %v1188_v56  ;;  %vm1206_vm9 = vweird.f32 %v1880_v61 }
 0x6e3   : > { %vm1207_vm11 = vmor %vm1205_vm10, %vm1206_vm9 }
 0x6e4   : > { %v1201_v53 = vmul.f32 %v1880_v61, %v1200_v63  ;;  %v1198_v0 = vsel %vm1197_vm8, %v1878_v55, %v1194_v62 }
 0x6e5   : > { %v1209_v4 = vmul.f32 %v1198_v0, %v1175_v42 }
 0x6e6   : > { %v1202_v1 = vmul.f32 0.5, %v1201_v53 }
 0x6e7   : > { %v1212_v8 = vmul.f32 %v1211_v3, %v1209_v4 }
 0x6e8   : > { %v1203_v2 = vsub.f32 1.5, %v1202_v1 }
 0x6e9   : > { %v1215_v12 = vadd.f32 %v1214_v7, %v1212_v8 }
 0x6ea   : > { %v1204_v5 = vmul.f32 %v1880_v61, %v1203_v2 }
 0x6ec   : > { %v1208_v6 = vsel %vm1207_vm11, %v1880_v61, %v1204_v5 }
 0x6ed   : > { %v1210_v9 = vmul.f32 %v1208_v6, %v1176_v46 }
 0x6ef   : > { %v1213_v11 = vmul.f32 %v1211_v3, %v1210_v9 }
 0x6f1   : > { %v1216_v15 = vadd.f32 %v1214_v7, %v1213_v11 }
 0x6f3   : > { %v1221_v16 = vpack.c.bf16 %v1216_v15, %v1215_v12 }
 0x6f5   : > { %1657 = vmatmul.msk.bf16.vlgmr.msra.gmra.mxu1 %vm522_vm1, %v1221_v16 }
 0x772   : > { %v1250_v25 = vpop.f32.mrf.mxu1 }
 0x773   : > { %v1251_v27 = vadd.f32 %v1844_v24, %v1250_v25 }
 0x775   : > { %v1257_v29 = vmul.f32 0.044715, %v1251_v27  ;;  %v1255_v44 = vmul.f32 0.5, %v1251_v27 }
 0x777   : > { %v1259_v30 = vmul.f32 %v1257_v29, %v1251_v27 }
 0x779   : > { %v1261_v31 = vmul.f32 %v1259_v30, %v1251_v27 }
 0x77a   : > { %v1252_v32 = vpop.f32.mrf.mxu1 }
 0x77b   : > { %v1263_v33 = vadd.f32 %v1261_v31, %v1251_v27  ;;  %v1253_v34 = vadd.f32 %v1844_v24, %v1252_v32 }
 0x77d   : > { %v1258_v35 = vmul.f32 0.044715, %v1253_v34  ;;  %v1265_v36 = vmul.f32 0.7978846, %v1263_v33  ;;  %v1256_v45 = vmul.f32 0.5, %v1253_v34 }
 0x77f   : > { %v1260_v37 = vmul.f32 %v1258_v35, %v1253_v34  ;;  %1881 = vtanh.f32 %v1265_v36 }
 0x781   : > { %v1262_v38 = vmul.f32 %v1260_v37, %v1253_v34 }
 0x783   : > { %v1264_v39 = vadd.f32 %v1262_v38, %v1253_v34 }
 0x785   : > { %v1266_v40 = vmul.f32 0.7978846, %v1264_v39  ;;  %v1882_v41 = vpop.eup %1881 }
 0x786   : > { %v1269_v42 = vadd.f32 1.0, %v1882_v41 }
 0x787   : > { %1883 = vtanh.f32 %v1266_v40 }
 0x788   : > { %v1271_v46 = vmul.f32 %v1269_v42, %v1255_v44 }
 0x78d   : > { %v1884_v43 = vpop.eup %1883 }
 0x78e   : > { %v1270_v13 = vadd.f32 1.0, %v1884_v43 }
 0x790   : > { %v1272_v47 = vmul.f32 %v1270_v13, %v1256_v45 }
 0x792   : > { %v1289_v48 = vpack.c.bf16 %v1272_v47, %v1271_v46 }
 0x794   : > { %1347 = vmatmul.bf16.vlgmr.msra.gmra.mxu2 %v1289_v48 }
 0x817   : > { %v1348_v14 = vpop.f32.mrf.mxu2 }
 0x818   : > { %v1349_v50 = vadd.f32 %v1348_v14, %v1290_v49 }
 0x81a   : > { %v1353_v51 = vadd.f32 %v1349_v50, %v1215_v12 }
 0x81c   : > { %v1355_v52 = vsel %vm522_vm1, %v1353_v51, 0.0 }
 0x81d   : > { %1356 = vadd.xlane.f32.xlu0 %v1355_v52 }
 0x81f   : > { %v1350_v26 = vpop.f32.mrf.mxu2 }
 0x820   : > { %v1351_v54 = vadd.f32 %v1350_v26, %v1290_v49 }
 0x822   : > { %v1354_v55 = vadd.f32 %v1351_v54, %v1216_v15 }
 0x824   : > { %v1358_v56 = vsel %vm522_vm1, %v1354_v55, 0.0 }
 0x825   : > { %1359 = vadd.xlane.f32.xlu0 %v1358_v56 }
 0x890   : > { %v1357_v57 = vpop.xlane.xlu0 %1356 }
 0x891   : > { %v1361_v58 = vmul.f32 0.03125, %v1357_v57 }
 0x893   : > { %v1363_v59 = vsub.f32 %v1353_v51, %v1361_v58 }
 0x895   : > { %v1365_v60 = vmul.f32 %v1363_v59, %v1363_v59 }
 0x897   : > { %v1367_v61 = vsel %vm522_vm1, %v1365_v60, 0.0 }
 0x898   : > { %1368 = vadd.xlane.f32.xlu0 %v1367_v61  ;;  %v1360_v62 = vpop.xlane.xlu0 %1359 }
 0x899   : > { %v1362_v63 = vmul.f32 0.03125, %v1360_v62 }
 0x89b   : > { %v1364_v53 = vsub.f32 %v1354_v55, %v1362_v63 }
 0x89d   : > { %v1366_v0 = vmul.f32 %v1364_v53, %v1364_v53 }
 0x89f   : > { %v1370_v1 = vsel %vm522_vm1, %v1366_v0, 0.0 }
 0x8a0   : > { %1371 = vadd.xlane.f32.xlu2 %v1370_v1 }
 0x90b   : > { %v1369_v2 = vpop.xlane.xlu0 %1368 }
 0x90c   : > { %v1373_v3 = vmul.f32 0.03125, %v1369_v2 }
 0x90e   : > { %v1375_v4 = vadd.f32 1e-05, %v1373_v3 }
 0x910   : > { %1885 = vrsqrt.f32 %v1375_v4  ;;  %vm1383_vm13 = vweird.f32 %v1375_v4 }
 0x913   : > { %v1372_v5 = vpop.xlane.xlu2 %1371 }
 0x914   : > { %v1374_v6 = vmul.f32 0.03125, %v1372_v5 }
 0x916   : > { %v1886_v7 = vpop.eup %1885  ;;  %v1376_v8 = vadd.f32 1e-05, %v1374_v6 }
 0x917   : > { %v1378_v9 = vmul.f32 %v1886_v7, %v1375_v4  ;;  %vm1384_vm12 = vweird.f32 %v1886_v7 }
 0x918   : > { %1887 = vrsqrt.f32 %v1376_v8  ;;  %vm1385_vm14 = vmor %vm1383_vm13, %vm1384_vm12  ;;  %vm1393_vm0 = vweird.f32 %v1376_v8 }
 0x919   : > { %v1379_v11 = vmul.f32 %v1886_v7, %v1378_v9 }
 0x91b   : > { %v1380_v12 = vmul.f32 0.5, %v1379_v11 }
 0x91d   : > { %v1381_v15 = vsub.f32 1.5, %v1380_v12 }
 0x91e   : > { %v1888_v16 = vpop.eup %1887 }
 0x91f   : > { %v1382_v17 = vmul.f32 %v1886_v7, %v1381_v15  ;;  %v1388_v18 = vmul.f32 %v1888_v16, %v1376_v8  ;;  %vm1394_vm15 = vweird.f32 %v1888_v16 }
 0x920   : > { %vm1395_vm2 = vmor %vm1393_vm0, %vm1394_vm15 }
 0x921   : > { %v1386_v20 = vsel %vm1385_vm14, %v1886_v7, %v1382_v17  ;;  %v1389_v21 = vmul.f32 %v1888_v16, %v1388_v18 }
 0x922   : > { %v1397_v22 = vmul.f32 %v1386_v20, %v1363_v59 }
 0x923   : > { %v1390_v23 = vmul.f32 0.5, %v1389_v21 }
 0x924   : > { %v1400_v24 = vmul.f32 %v1399_v19, %v1397_v22 }
 0x925   : > { %v1391_v25 = vsub.f32 1.5, %v1390_v23 }
 0x926   : > { %v1403_v27 = vadd.f32 %v1402_v28, %v1400_v24 }
 0x927   : > { %v1392_v29 = vmul.f32 %v1888_v16, %v1391_v25 }
 0x928   : > { %1405 = vst.msk [vmem:[%s2162_s21] sm:$0xff] %vm522_vm1, %v1403_v27 }
 0x929   : > { %v1396_v10 = vsel %vm1395_vm2, %v1888_v16, %v1392_v29 }
 0x92a   : > { %v1398_v30 = vmul.f32 %v1396_v10, %v1364_v53 }
 0x92c   : > { %v1401_v31 = vmul.f32 %v1399_v19, %v1398_v30 }
 0x92e   : > { %v1404_v32 = vadd.f32 %v1402_v28, %v1401_v31 }
 0x930   : > { %1406 = vst.msk [vmem:[%s2162_s21 + $0x8] sm:$0xff] %vm522_vm1, %v1404_v32 }
 0x931   : > { %1916 = shalt.err (!%p1913_p8)
}
 0x932   : > { %s1996_s21 = smov 128  }
 0x933   : > { %1717 = dma.vmem_to_hbm [thread:$0]  (%p2096_p3), %s1421_s20, 256, %s1423_s0, %s1408_s1, %s1996_s21, %s1996_s21, %s1993_s17  }
 0x934 PF: > { %s2402_s27 = sld [smem:[#allocation9_spill]] }
 0x935   : > { %s2403_s18 = sld [smem:[#allocation5_spill]] }
 0x93a   : > { %p1723_p10 = scmp.ge.s32.totalorder %s2402_s27, 2 }
 0x93b   : > { %s1437_s9 = sand.u32 1, %s2403_s18  }
 0x93c   : > { %p1720_p11 = pnand %p1723_p10, %p2106_p9  ;;  %s1438_s16 = scalar_lea.sflag [#allocation3], %s1437_s9 }
 0x93e   : > { %p1721_p12 = pneg %p1720_p11 }
 0x940   : > { %1950 = dma.done.wait (%p1721_p12), %s1438_s16, 256  }
 0x941   : > { %1952 = vsyncadd (%p1721_p12), %s1438_s16, 4294967040  ;;  %s22_s16 = sadd.s32 1, %s2402_s27   ;;  %s2405_s29 = sld [smem:[#allocation6_spill]] }
 0x942   : > { %p19_p13 = scmp.ge.s32.totalorder %s22_s16, 6   ;;  %s2406_s11 = sld [smem:[#allocation14_spill]] }
 0x943   : > { %s2407_s12 = sld [smem:[#allocation7_spill]]  ;;  %s2411_s30 = smov %s1959_s10 }
 0x944   : > { %s2408_s13 = sld [smem:[#allocation8_spill]]  ;;  %21 = sbr.rel (!%p19_p13) target bundleno = 11 (0xb), region = 119 }
 0x945   : > { %s2409_s14 = sld [smem:[#allocation10_spill]] }
 0x946   : > { %s2410_s15 = sld [smem:[#allocation12_spill]] }
 0x947   : > { %s2412_s10 = smov %s2405_s29 }
 0x949   :  { %1444 = vsyncpa [#allocation3], 1 }
 0x94a   :  { %1446 = vsyncpa [#allocation3 + $0x1], 1 }

</bundles_post_ra>
